<compile_context>
chip_gen: v7x
topology: tpu7x:2x2x1
jax: 0.10.0
libtpu: 0.0.40
codegen_flags: <defaults>
</compile_context>

<pallas_src>
import functools

import jax
import jax.numpy as jnp
from jax.experimental import pallas as pl
from jax.experimental.pallas import tpu as pltpu


def _round_up(x, m):
    return ((x + m - 1) // m) * m


def _mlp_predictor_kernel(B_pad, L, E,
                          tok_ref,                      # SMEM, (B_pad*L,) int32
                          emb_ref, w1_ref, b1_ref,      # VMEM blocks
                          w2_ref, b2_ref,
                          out_ref,                      # (B_pad, TILE_V) f32
                          x_ref, h_ref):                # VMEM scratch
    j = pl.program_id(0)

    # Embedding gather + fc1 + ReLU are invariant across vocab tiles:
    # compute once on the first tile, reuse h for all later tiles.
    @pl.when(j == 0)
    def _build_hidden():
        # Scalar-driven gather: token id from SMEM -> dynamic row read from the
        # f32 table in VMEM, written at its flatten-offset l*E so the activation
        # is already (B_pad, L*E) and fc1 is one clean 2-D dot (K = L*E).
        # TODO(synk): for very large vocabularies keep the table in HBM
        # (memory_space=pl.ANY) and DMA-gather rows instead of a full VMEM block.
        for b in range(B_pad):
            for l in range(L):
                tok = tok_ref[b * L + l]
                x_ref[b:b + 1, l * E:(l + 1) * E] = emb_ref[pl.ds(tok, 1), :]

        x = x_ref[...].astype(jnp.bfloat16)                      # (B_pad, L*E)
        h = jnp.dot(x, w1_ref[...], preferred_element_type=jnp.float32)
        h = jnp.maximum(h + b1_ref[...], 0.0)                    # bias+ReLU f32
        h_ref[...] = h.astype(jnp.bfloat16)                      # bf16 MXU operand

    # fc2 for this vocab tile (bf16 MXU operands, f32 accumulation).
    out_ref[...] = (
        jnp.dot(h_ref[...], w2_ref[...], preferred_element_type=jnp.float32)
        + b2_ref[...]
    )


def mlp_predictor(tokens, embed_table, w1, b1, w2, b2, *, tile_v=512):
    """tokens: [B, L] int32; embed_table: [V, E]; w1: [L*E, H]; b1: [H];
    w2: [H, V]; b2: [V]  ->  logits [B, V] float32."""
    B, L = tokens.shape
    V, E = embed_table.shape
    H = w1.shape[1]

    # Pad: sublane-(8) batch, lane-(128) hidden, lane-(128)-multiple vocab tiles.
    B_pad = _round_up(B, 8)
    H_pad = _round_up(H, 128)
    tile_v = min(tile_v, _round_up(V, 128))
    V_pad = _round_up(V, tile_v)
    n_v_tiles = V_pad // tile_v

    # Token ids, flattened 1-D for SMEM scalar prefetch; pad rows use id 0.
    tok_flat = jnp.zeros((B_pad * L,), jnp.int32).at[:B * L].set(
        tokens.reshape(-1).astype(jnp.int32))

    # Table stays f32 (robust dynamic row reads); big matmul weights go bf16.
    # Zero-padding of w1 cols / b1 / w2 rows keeps the math exact (ReLU(0)=0
    # and padded w2 rows are zero).
    emb_f32 = embed_table.astype(jnp.float32)                          # (V, E)
    w1_bf = jnp.zeros((L * E, H_pad), jnp.bfloat16).at[:, :H].set(
        w1.astype(jnp.bfloat16))                                       # (L*E, H_pad)
    b1_2d = jnp.zeros((1, H_pad), jnp.float32).at[:, :H].set(
        b1.astype(jnp.float32))                                        # (1, H_pad)
    w2_bf = jnp.zeros((H_pad, V_pad), jnp.bfloat16).at[:H, :V].set(
        w2.astype(jnp.bfloat16))                                       # (H_pad, V_pad)
    b2_2d = jnp.zeros((1, V_pad), jnp.float32).at[:, :V].set(
        b2.astype(jnp.float32))                                        # (1, V_pad)

    kernel = functools.partial(_mlp_predictor_kernel, B_pad, L, E)

    grid_spec = pltpu.PrefetchScalarGridSpec(
        num_scalar_prefetch=1,                 # tok_flat -> SMEM
        grid=(n_v_tiles,),
        in_specs=[
            pl.BlockSpec((V, E), lambda j, tok: (0, 0)),               # embed table
            pl.BlockSpec((L * E, H_pad), lambda j, tok: (0, 0)),       # w1
            pl.BlockSpec((1, H_pad), lambda j, tok: (0, 0)),           # b1
            pl.BlockSpec((H_pad, tile_v), lambda j, tok: (0, j)),      # w2 vocab tile
            pl.BlockSpec((1, tile_v), lambda j, tok: (0, j)),          # b2 vocab tile
        ],
        out_specs=pl.BlockSpec((B_pad, tile_v), lambda j, tok: (0, j)),
        scratch_shapes=[
            pltpu.VMEM((B_pad, L * E), jnp.float32),                   # gathered acts
            pltpu.VMEM((B_pad, H_pad), jnp.bfloat16),                  # hidden (ReLU'd)
        ],
    )

    out_pad = pl.pallas_call(
        kernel,
        out_shape=jax.ShapeDtypeStruct((B_pad, V_pad), jnp.float32),
        grid_spec=grid_spec,
        compiler_params=pltpu.CompilerParams(
            # h is built at j==0 and reused -> vocab axis must run sequentially.
            dimension_semantics=("arbitrary",),
            vmem_limit_bytes=32 * 1024 * 1024,   # leaves headroom on v7x (64 MiB)
        ),
    )(tok_flat, emb_f32, w1_bf, b1_2d, w2_bf, b2_2d)

    return out_pad[:B, :V]


def _reference(tokens, embed_table, w1, b1, w2, b2):
    emb = jnp.take(embed_table, tokens, axis=0)           # (B, L, E)
    x = emb.reshape(tokens.shape[0], -1)                  # (B, L*E)
    h = jnp.maximum(x @ w1 + b1, 0.0)
    return h @ w2 + b2


if __name__ == "__main__":
    # Small, deterministic shapes consistent with the module's defaults.
    B, L, E, H, V = 2, 8, 32, 64, 16

    key = jax.random.PRNGKey(0)
    k_tok, k_emb, k_w1, k_b1, k_w2, k_b2 = jax.random.split(key, 6)

    tokens = jax.random.randint(k_tok, (B, L), 0, V, dtype=jnp.int32)
    embed_table = jax.random.normal(k_emb, (V, E), dtype=jnp.float32)
    # nn.Linear-style init (uniform in +/- 1/sqrt(fan_in)); stored as [in, out].
    w1 = jax.random.uniform(k_w1, (L * E, H), jnp.float32,
                            -1.0 / (L * E) ** 0.5, 1.0 / (L * E) ** 0.5)
    b1 = jax.random.uniform(k_b1, (H,), jnp.float32,
                            -1.0 / (L * E) ** 0.5, 1.0 / (L * E) ** 0.5)
    w2 = jax.random.uniform(k_w2, (H, V), jnp.float32,
                            -1.0 / H ** 0.5, 1.0 / H ** 0.5)
    b2 = jax.random.uniform(k_b2, (V,), jnp.float32,
                            -1.0 / H ** 0.5, 1.0 / H ** 0.5)

    out = mlp_predictor(tokens, embed_table, w1, b1, w2, b2)
    out = jax.block_until_ready(out)

    ref = _reference(tokens, embed_table, w1, b1, w2, b2)
    assert out.shape == (B, V)
    # bf16 matmul operands (f32 accumulation) vs. the pure-f32 reference.
    assert jnp.allclose(out, ref, atol=2e-2, rtol=2e-2)

    print("KERNEL_OK")
</pallas_src>

<mosaic_0001>
module attributes {stable_mosaic.version = 11 : i64} {
  func.func @_mlp_predictor_kernel(%arg0: i32, %arg1: memref<64xi32, #tpu.memory_space<smem>>, %arg2: memref<16x32xf32, #tpu.memory_space<vmem>>, %arg3: memref<256x128xbf16, #tpu.memory_space<vmem>>, %arg4: memref<1x128xf32, #tpu.memory_space<vmem>>, %arg5: memref<128x128xbf16, #tpu.memory_space<vmem>>, %arg6: memref<1x128xf32, #tpu.memory_space<vmem>>, %arg7: memref<8x128xf32, #tpu.memory_space<vmem>>, %arg8: memref<8x256xf32, #tpu.memory_space<vmem>>, %arg9: memref<8x128xbf16, #tpu.memory_space<vmem>>) attributes {dimension_semantics = [#tpu.dimension_semantics<arbitrary>], iteration_bounds = array<i64: 1>, scalar_prefetch = 1 : i64, scratch_operands = 2 : i64, tpu.core_type = #tpu.core_type<tc>, window_params = [{pipeline_mode = #tpu.pipeline_mode<synchronous>, transform_indices = @transform_0, window_bounds = array<i64: 16, 32>}, {pipeline_mode = #tpu.pipeline_mode<synchronous>, transform_indices = @transform_1, window_bounds = array<i64: 256, 128>}, {pipeline_mode = #tpu.pipeline_mode<synchronous>, transform_indices = @transform_2, window_bounds = array<i64: 1, 128>}, {transform_indices = @transform_3, window_bounds = array<i64: 128, 128>}, {transform_indices = @transform_4, window_bounds = array<i64: 1, 128>}, {transform_indices = @transform_5, window_bounds = array<i64: 8, 128>}]} {
    %c0_i32 = arith.constant 0 : i32
    %0 = arith.cmpi eq, %arg0, %c0_i32 : i32
    %1 = arith.extui %0 : i1 to i32
    %c0_i32_0 = arith.constant 0 : i32
    %2 = arith.cmpi ne, %1, %c0_i32_0 : i32
    scf.if %2 {
      %c0_8 = arith.constant 0 : index
      %10 = memref.load %arg1[%c0_8] : memref<64xi32, #tpu.memory_space<smem>>
      %11 = arith.index_cast %10 : i32 to index
      %c0_9 = arith.constant 0 : index
      %12 = vector.load %arg2[%11, %c0_9] : memref<16x32xf32, #tpu.memory_space<vmem>>, vector<1x32xf32>
      %c0_10 = arith.constant 0 : index
      %c0_11 = arith.constant 0 : index
      %13 = vector.load %arg8[%c0_10, %c0_11] : memref<8x256xf32, #tpu.memory_space<vmem>>, vector<1x32xf32>
      tpu.vector_store %arg8[%c0_10, %c0_11], %12 {strides = array<i32>} : memref<8x256xf32, #tpu.memory_space<vmem>>, vector<1x32xf32>,
      %c1 = arith.constant 1 : index
      %14 = memref.load %arg1[%c1] : memref<64xi32, #tpu.memory_space<smem>>
      %15 = arith.index_cast %14 : i32 to index
      %c0_12 = arith.constant 0 : index
      %16 = vector.load %arg2[%15, %c0_12] : memref<16x32xf32, #tpu.memory_space<vmem>>, vector<1x32xf32>
      %c0_13 = arith.constant 0 : index
      %c32 = arith.constant 32 : index
      %17 = vector.load %arg8[%c0_13, %c32] : memref<8x256xf32, #tpu.memory_space<vmem>>, vector<1x32xf32>
      tpu.vector_store %arg8[%c0_13, %c32], %16 {strides = array<i32>} : memref<8x256xf32, #tpu.memory_space<vmem>>, vector<1x32xf32>,
      %c2 = arith.constant 2 : index
      %18 = memref.load %arg1[%c2] : memref<64xi32, #tpu.memory_space<smem>>
      %19 = arith.index_cast %18 : i32 to index
      %c0_14 = arith.constant 0 : index
      %20 = vector.load %arg2[%19, %c0_14] : memref<16x32xf32, #tpu.memory_space<vmem>>, vector<1x32xf32>
      %c0_15 = arith.constant 0 : index
      %c64 = arith.constant 64 : index
      %21 = vector.load %arg8[%c0_15, %c64] : memref<8x256xf32, #tpu.memory_space<vmem>>, vector<1x32xf32>
      tpu.vector_store %arg8[%c0_15, %c64], %20 {strides = array<i32>} : memref<8x256xf32, #tpu.memory_space<vmem>>, vector<1x32xf32>,
      %c3 = arith.constant 3 : index
      %22 = memref.load %arg1[%c3] : memref<64xi32, #tpu.memory_space<smem>>
      %23 = arith.index_cast %22 : i32 to index
      %c0_16 = arith.constant 0 : index
      %24 = vector.load %arg2[%23, %c0_16] : memref<16x32xf32, #tpu.memory_space<vmem>>, vector<1x32xf32>
      %c0_17 = arith.constant 0 : index
      %c96 = arith.constant 96 : index
      %25 = vector.load %arg8[%c0_17, %c96] : memref<8x256xf32, #tpu.memory_space<vmem>>, vector<1x32xf32>
      tpu.vector_store %arg8[%c0_17, %c96], %24 {strides = array<i32>} : memref<8x256xf32, #tpu.memory_space<vmem>>, vector<1x32xf32>,
      %c4 = arith.constant 4 : index
      %26 = memref.load %arg1[%c4] : memref<64xi32, #tpu.memory_space<smem>>
      %27 = arith.index_cast %26 : i32 to index
      %c0_18 = arith.constant 0 : index
      %28 = vector.load %arg2[%27, %c0_18] : memref<16x32xf32, #tpu.memory_space<vmem>>, vector<1x32xf32>
      %c0_19 = arith.constant 0 : index
      %c128 = arith.constant 128 : index
      %29 = vector.load %arg8[%c0_19, %c128] : memref<8x256xf32, #tpu.memory_space<vmem>>, vector<1x32xf32>
      tpu.vector_store %arg8[%c0_19, %c128], %28 {strides = array<i32>} : memref<8x256xf32, #tpu.memory_space<vmem>>, vector<1x32xf32>,
      %c5 = arith.constant 5 : index
      %30 = memref.load %arg1[%c5] : memref<64xi32, #tpu.memory_space<smem>>
      %31 = arith.index_cast %30 : i32 to index
      %c0_20 = arith.constant 0 : index
      %32 = vector.load %arg2[%31, %c0_20] : memref<16x32xf32, #tpu.memory_space<vmem>>, vector<1x32xf32>
      %c0_21 = arith.constant 0 : index
      %c160 = arith.constant 160 : index
      %33 = vector.load %arg8[%c0_21, %c160] : memref<8x256xf32, #tpu.memory_space<vmem>>, vector<1x32xf32>
      tpu.vector_store %arg8[%c0_21, %c160], %32 {strides = array<i32>} : memref<8x256xf32, #tpu.memory_space<vmem>>, vector<1x32xf32>,
      %c6 = arith.constant 6 : index
      %34 = memref.load %arg1[%c6] : memref<64xi32, #tpu.memory_space<smem>>
      %35 = arith.index_cast %34 : i32 to index
      %c0_22 = arith.constant 0 : index
      %36 = vector.load %arg2[%35, %c0_22] : memref<16x32xf32, #tpu.memory_space<vmem>>, vector<1x32xf32>
      %c0_23 = arith.constant 0 : index
      %c192 = arith.constant 192 : index
      %37 = vector.load %arg8[%c0_23, %c192] : memref<8x256xf32, #tpu.memory_space<vmem>>, vector<1x32xf32>
      tpu.vector_store %arg8[%c0_23, %c192], %36 {strides = array<i32>} : memref<8x256xf32, #tpu.memory_space<vmem>>, vector<1x32xf32>,
      %c7 = arith.constant 7 : index
      %38 = memref.load %arg1[%c7] : memref<64xi32, #tpu.memory_space<smem>>
      %39 = arith.index_cast %38 : i32 to index
      %c0_24 = arith.constant 0 : index
      %40 = vector.load %arg2[%39, %c0_24] : memref<16x32xf32, #tpu.memory_space<vmem>>, vector<1x32xf32>
      %c0_25 = arith.constant 0 : index
      %c224 = arith.constant 224 : index
      %41 = vector.load %arg8[%c0_25, %c224] : memref<8x256xf32, #tpu.memory_space<vmem>>, vector<1x32xf32>
      tpu.vector_store %arg8[%c0_25, %c224], %40 {strides = array<i32>} : memref<8x256xf32, #tpu.memory_space<vmem>>, vector<1x32xf32>,
      %c8 = arith.constant 8 : index
      %42 = memref.load %arg1[%c8] : memref<64xi32, #tpu.memory_space<smem>>
      %43 = arith.index_cast %42 : i32 to index
      %c0_26 = arith.constant 0 : index
      %44 = vector.load %arg2[%43, %c0_26] : memref<16x32xf32, #tpu.memory_space<vmem>>, vector<1x32xf32>
      %c1_27 = arith.constant 1 : index
      %c0_28 = arith.constant 0 : index
      %45 = vector.load %arg8[%c1_27, %c0_28] : memref<8x256xf32, #tpu.memory_space<vmem>>, vector<1x32xf32>
      tpu.vector_store %arg8[%c1_27, %c0_28], %44 {strides = array<i32>} : memref<8x256xf32, #tpu.memory_space<vmem>>, vector<1x32xf32>,
      %c9 = arith.constant 9 : index
      %46 = memref.load %arg1[%c9] : memref<64xi32, #tpu.memory_space<smem>>
      %47 = arith.index_cast %46 : i32 to index
      %c0_29 = arith.constant 0 : index
      %48 = vector.load %arg2[%47, %c0_29] : memref<16x32xf32, #tpu.memory_space<vmem>>, vector<1x32xf32>
      %c1_30 = arith.constant 1 : index
      %c32_31 = arith.constant 32 : index
      %49 = vector.load %arg8[%c1_30, %c32_31] : memref<8x256xf32, #tpu.memory_space<vmem>>, vector<1x32xf32>
      tpu.vector_store %arg8[%c1_30, %c32_31], %48 {strides = array<i32>} : memref<8x256xf32, #tpu.memory_space<vmem>>, vector<1x32xf32>,
      %c10 = arith.constant 10 : index
      %50 = memref.load %arg1[%c10] : memref<64xi32, #tpu.memory_space<smem>>
      %51 = arith.index_cast %50 : i32 to index
      %c0_32 = arith.constant 0 : index
      %52 = vector.load %arg2[%51, %c0_32] : memref<16x32xf32, #tpu.memory_space<vmem>>, vector<1x32xf32>
      %c1_33 = arith.constant 1 : index
      %c64_34 = arith.constant 64 : index
      %53 = vector.load %arg8[%c1_33, %c64_34] : memref<8x256xf32, #tpu.memory_space<vmem>>, vector<1x32xf32>
      tpu.vector_store %arg8[%c1_33, %c64_34], %52 {strides = array<i32>} : memref<8x256xf32, #tpu.memory_space<vmem>>, vector<1x32xf32>,
      %c11 = arith.constant 11 : index
      %54 = memref.load %arg1[%c11] : memref<64xi32, #tpu.memory_space<smem>>
      %55 = arith.index_cast %54 : i32 to index
      %c0_35 = arith.constant 0 : index
      %56 = vector.load %arg2[%55, %c0_35] : memref<16x32xf32, #tpu.memory_space<vmem>>, vector<1x32xf32>
      %c1_36 = arith.constant 1 : index
      %c96_37 = arith.constant 96 : index
      %57 = vector.load %arg8[%c1_36, %c96_37] : memref<8x256xf32, #tpu.memory_space<vmem>>, vector<1x32xf32>
      tpu.vector_store %arg8[%c1_36, %c96_37], %56 {strides = array<i32>} : memref<8x256xf32, #tpu.memory_space<vmem>>, vector<1x32xf32>,
      %c12 = arith.constant 12 : index
      %58 = memref.load %arg1[%c12] : memref<64xi32, #tpu.memory_space<smem>>
      %59 = arith.index_cast %58 : i32 to index
      %c0_38 = arith.constant 0 : index
      %60 = vector.load %arg2[%59, %c0_38] : memref<16x32xf32, #tpu.memory_space<vmem>>, vector<1x32xf32>
      %c1_39 = arith.constant 1 : index
      %c128_40 = arith.constant 128 : index
      %61 = vector.load %arg8[%c1_39, %c128_40] : memref<8x256xf32, #tpu.memory_space<vmem>>, vector<1x32xf32>
      tpu.vector_store %arg8[%c1_39, %c128_40], %60 {strides = array<i32>} : memref<8x256xf32, #tpu.memory_space<vmem>>, vector<1x32xf32>,
      %c13 = arith.constant 13 : index
      %62 = memref.load %arg1[%c13] : memref<64xi32, #tpu.memory_space<smem>>
      %63 = arith.index_cast %62 : i32 to index
      %c0_41 = arith.constant 0 : index
      %64 = vector.load %arg2[%63, %c0_41] : memref<16x32xf32, #tpu.memory_space<vmem>>, vector<1x32xf32>
      %c1_42 = arith.constant 1 : index
      %c160_43 = arith.constant 160 : index
      %65 = vector.load %arg8[%c1_42, %c160_43] : memref<8x256xf32, #tpu.memory_space<vmem>>, vector<1x32xf32>
      tpu.vector_store %arg8[%c1_42, %c160_43], %64 {strides = array<i32>} : memref<8x256xf32, #tpu.memory_space<vmem>>, vector<1x32xf32>,
      %c14 = arith.constant 14 : index
      %66 = memref.load %arg1[%c14] : memref<64xi32, #tpu.memory_space<smem>>
      %67 = arith.index_cast %66 : i32 to index
      %c0_44 = arith.constant 0 : index
      %68 = vector.load %arg2[%67, %c0_44] : memref<16x32xf32, #tpu.memory_space<vmem>>, vector<1x32xf32>
      %c1_45 = arith.constant 1 : index
      %c192_46 = arith.constant 192 : index
      %69 = vector.load %arg8[%c1_45, %c192_46] : memref<8x256xf32, #tpu.memory_space<vmem>>, vector<1x32xf32>
      tpu.vector_store %arg8[%c1_45, %c192_46], %68 {strides = array<i32>} : memref<8x256xf32, #tpu.memory_space<vmem>>, vector<1x32xf32>,
      %c15 = arith.constant 15 : index
      %70 = memref.load %arg1[%c15] : memref<64xi32, #tpu.memory_space<smem>>
      %71 = arith.index_cast %70 : i32 to index
      %c0_47 = arith.constant 0 : index
      %72 = vector.load %arg2[%71, %c0_47] : memref<16x32xf32, #tpu.memory_space<vmem>>, vector<1x32xf32>
      %c1_48 = arith.constant 1 : index
      %c224_49 = arith.constant 224 : index
      %73 = vector.load %arg8[%c1_48, %c224_49] : memref<8x256xf32, #tpu.memory_space<vmem>>, vector<1x32xf32>
      tpu.vector_store %arg8[%c1_48, %c224_49], %72 {strides = array<i32>} : memref<8x256xf32, #tpu.memory_space<vmem>>, vector<1x32xf32>,
      %c16 = arith.constant 16 : index
      %74 = memref.load %arg1[%c16] : memref<64xi32, #tpu.memory_space<smem>>
      %75 = arith.index_cast %74 : i32 to index
      %c0_50 = arith.constant 0 : index
      %76 = vector.load %arg2[%75, %c0_50] : memref<16x32xf32, #tpu.memory_space<vmem>>, vector<1x32xf32>
      %c2_51 = arith.constant 2 : index
      %c0_52 = arith.constant 0 : index
      %77 = vector.load %arg8[%c2_51, %c0_52] : memref<8x256xf32, #tpu.memory_space<vmem>>, vector<1x32xf32>
      tpu.vector_store %arg8[%c2_51, %c0_52], %76 {strides = array<i32>} : memref<8x256xf32, #tpu.memory_space<vmem>>, vector<1x32xf32>,
      %c17 = arith.constant 17 : index
      %78 = memref.load %arg1[%c17] : memref<64xi32, #tpu.memory_space<smem>>
      %79 = arith.index_cast %78 : i32 to index
      %c0_53 = arith.constant 0 : index
      %80 = vector.load %arg2[%79, %c0_53] : memref<16x32xf32, #tpu.memory_space<vmem>>, vector<1x32xf32>
      %c2_54 = arith.constant 2 : index
      %c32_55 = arith.constant 32 : index
      %81 = vector.load %arg8[%c2_54, %c32_55] : memref<8x256xf32, #tpu.memory_space<vmem>>, vector<1x32xf32>
      tpu.vector_store %arg8[%c2_54, %c32_55], %80 {strides = array<i32>} : memref<8x256xf32, #tpu.memory_space<vmem>>, vector<1x32xf32>,
      %c18 = arith.constant 18 : index
      %82 = memref.load %arg1[%c18] : memref<64xi32, #tpu.memory_space<smem>>
      %83 = arith.index_cast %82 : i32 to index
      %c0_56 = arith.constant 0 : index
      %84 = vector.load %arg2[%83, %c0_56] : memref<16x32xf32, #tpu.memory_space<vmem>>, vector<1x32xf32>
      %c2_57 = arith.constant 2 : index
      %c64_58 = arith.constant 64 : index
      %85 = vector.load %arg8[%c2_57, %c64_58] : memref<8x256xf32, #tpu.memory_space<vmem>>, vector<1x32xf32>
      tpu.vector_store %arg8[%c2_57, %c64_58], %84 {strides = array<i32>} : memref<8x256xf32, #tpu.memory_space<vmem>>, vector<1x32xf32>,
      %c19 = arith.constant 19 : index
      %86 = memref.load %arg1[%c19] : memref<64xi32, #tpu.memory_space<smem>>
      %87 = arith.index_cast %86 : i32 to index
      %c0_59 = arith.constant 0 : index
      %88 = vector.load %arg2[%87, %c0_59] : memref<16x32xf32, #tpu.memory_space<vmem>>, vector<1x32xf32>
      %c2_60 = arith.constant 2 : index
      %c96_61 = arith.constant 96 : index
      %89 = vector.load %arg8[%c2_60, %c96_61] : memref<8x256xf32, #tpu.memory_space<vmem>>, vector<1x32xf32>
      tpu.vector_store %arg8[%c2_60, %c96_61], %88 {strides = array<i32>} : memref<8x256xf32, #tpu.memory_space<vmem>>, vector<1x32xf32>,
      %c20 = arith.constant 20 : index
      %90 = memref.load %arg1[%c20] : memref<64xi32, #tpu.memory_space<smem>>
      %91 = arith.index_cast %90 : i32 to index
      %c0_62 = arith.constant 0 : index
      %92 = vector.load %arg2[%91, %c0_62] : memref<16x32xf32, #tpu.memory_space<vmem>>, vector<1x32xf32>
      %c2_63 = arith.constant 2 : index
      %c128_64 = arith.constant 128 : index
      %93 = vector.load %arg8[%c2_63, %c128_64] : memref<8x256xf32, #tpu.memory_space<vmem>>, vector<1x32xf32>
      tpu.vector_store %arg8[%c2_63, %c128_64], %92 {strides = array<i32>} : memref<8x256xf32, #tpu.memory_space<vmem>>, vector<1x32xf32>,
      %c21 = arith.constant 21 : index
      %94 = memref.load %arg1[%c21] : memref<64xi32, #tpu.memory_space<smem>>
      %95 = arith.index_cast %94 : i32 to index
      %c0_65 = arith.constant 0 : index
      %96 = vector.load %arg2[%95, %c0_65] : memref<16x32xf32, #tpu.memory_space<vmem>>, vector<1x32xf32>
      %c2_66 = arith.constant 2 : index
      %c160_67 = arith.constant 160 : index
      %97 = vector.load %arg8[%c2_66, %c160_67] : memref<8x256xf32, #tpu.memory_space<vmem>>, vector<1x32xf32>
      tpu.vector_store %arg8[%c2_66, %c160_67], %96 {strides = array<i32>} : memref<8x256xf32, #tpu.memory_space<vmem>>, vector<1x32xf32>,
      %c22 = arith.constant 22 : index
      %98 = memref.load %arg1[%c22] : memref<64xi32, #tpu.memory_space<smem>>
      %99 = arith.index_cast %98 : i32 to index
      %c0_68 = arith.constant 0 : index
      %100 = vector.load %arg2[%99, %c0_68] : memref<16x32xf32, #tpu.memory_space<vmem>>, vector<1x32xf32>
      %c2_69 = arith.constant 2 : index
      %c192_70 = arith.constant 192 : index
      %101 = vector.load %arg8[%c2_69, %c192_70] : memref<8x256xf32, #tpu.memory_space<vmem>>, vector<1x32xf32>
      tpu.vector_store %arg8[%c2_69, %c192_70], %100 {strides = array<i32>} : memref<8x256xf32, #tpu.memory_space<vmem>>, vector<1x32xf32>,
      %c23 = arith.constant 23 : index
      %102 = memref.load %arg1[%c23] : memref<64xi32, #tpu.memory_space<smem>>
      %103 = arith.index_cast %102 : i32 to index
      %c0_71 = arith.constant 0 : index
      %104 = vector.load %arg2[%103, %c0_71] : memref<16x32xf32, #tpu.memory_space<vmem>>, vector<1x32xf32>
      %c2_72 = arith.constant 2 : index
      %c224_73 = arith.constant 224 : index
      %105 = vector.load %arg8[%c2_72, %c224_73] : memref<8x256xf32, #tpu.memory_space<vmem>>, vector<1x32xf32>
      tpu.vector_store %arg8[%c2_72, %c224_73], %104 {strides = array<i32>} : memref<8x256xf32, #tpu.memory_space<vmem>>, vector<1x32xf32>,
      %c24 = arith.constant 24 : index
      %106 = memref.load %arg1[%c24] : memref<64xi32, #tpu.memory_space<smem>>
      %107 = arith.index_cast %106 : i32 to index
      %c0_74 = arith.constant 0 : index
      %108 = vector.load %arg2[%107, %c0_74] : memref<16x32xf32, #tpu.memory_space<vmem>>, vector<1x32xf32>
      %c3_75 = arith.constant 3 : index
      %c0_76 = arith.constant 0 : index
      %109 = vector.load %arg8[%c3_75, %c0_76] : memref<8x256xf32, #tpu.memory_space<vmem>>, vector<1x32xf32>
      tpu.vector_store %arg8[%c3_75, %c0_76], %108 {strides = array<i32>} : memref<8x256xf32, #tpu.memory_space<vmem>>, vector<1x32xf32>,
      %c25 = arith.constant 25 : index
      %110 = memref.load %arg1[%c25] : memref<64xi32, #tpu.memory_space<smem>>
      %111 = arith.index_cast %110 : i32 to index
      %c0_77 = arith.constant 0 : index
      %112 = vector.load %arg2[%111, %c0_77] : memref<16x32xf32, #tpu.memory_space<vmem>>, vector<1x32xf32>
      %c3_78 = arith.constant 3 : index
      %c32_79 = arith.constant 32 : index
      %113 = vector.load %arg8[%c3_78, %c32_79] : memref<8x256xf32, #tpu.memory_space<vmem>>, vector<1x32xf32>
      tpu.vector_store %arg8[%c3_78, %c32_79], %112 {strides = array<i32>} : memref<8x256xf32, #tpu.memory_space<vmem>>, vector<1x32xf32>,
      %c26 = arith.constant 26 : index
      %114 = memref.load %arg1[%c26] : memref<64xi32, #tpu.memory_space<smem>>
      %115 = arith.index_cast %114 : i32 to index
      %c0_80 = arith.constant 0 : index
      %116 = vector.load %arg2[%115, %c0_80] : memref<16x32xf32, #tpu.memory_space<vmem>>, vector<1x32xf32>
      %c3_81 = arith.constant 3 : index
      %c64_82 = arith.constant 64 : index
      %117 = vector.load %arg8[%c3_81, %c64_82] : memref<8x256xf32, #tpu.memory_space<vmem>>, vector<1x32xf32>
      tpu.vector_store %arg8[%c3_81, %c64_82], %116 {strides = array<i32>} : memref<8x256xf32, #tpu.memory_space<vmem>>, vector<1x32xf32>,
      %c27 = arith.constant 27 : index
      %118 = memref.load %arg1[%c27] : memref<64xi32, #tpu.memory_space<smem>>
      %119 = arith.index_cast %118 : i32 to index
      %c0_83 = arith.constant 0 : index
      %120 = vector.load %arg2[%119, %c0_83] : memref<16x32xf32, #tpu.memory_space<vmem>>, vector<1x32xf32>
      %c3_84 = arith.constant 3 : index
      %c96_85 = arith.constant 96 : index
      %121 = vector.load %arg8[%c3_84, %c96_85] : memref<8x256xf32, #tpu.memory_space<vmem>>, vector<1x32xf32>
      tpu.vector_store %arg8[%c3_84, %c96_85], %120 {strides = array<i32>} : memref<8x256xf32, #tpu.memory_space<vmem>>, vector<1x32xf32>,
      %c28 = arith.constant 28 : index
      %122 = memref.load %arg1[%c28] : memref<64xi32, #tpu.memory_space<smem>>
      %123 = arith.index_cast %122 : i32 to index
      %c0_86 = arith.constant 0 : index
      %124 = vector.load %arg2[%123, %c0_86] : memref<16x32xf32, #tpu.memory_space<vmem>>, vector<1x32xf32>
      %c3_87 = arith.constant 3 : index
      %c128_88 = arith.constant 128 : index
      %125 = vector.load %arg8[%c3_87, %c128_88] : memref<8x256xf32, #tpu.memory_space<vmem>>, vector<1x32xf32>
      tpu.vector_store %arg8[%c3_87, %c128_88], %124 {strides = array<i32>} : memref<8x256xf32, #tpu.memory_space<vmem>>, vector<1x32xf32>,
      %c29 = arith.constant 29 : index
      %126 = memref.load %arg1[%c29] : memref<64xi32, #tpu.memory_space<smem>>
      %127 = arith.index_cast %126 : i32 to index
      %c0_89 = arith.constant 0 : index
      %128 = vector.load %arg2[%127, %c0_89] : memref<16x32xf32, #tpu.memory_space<vmem>>, vector<1x32xf32>
      %c3_90 = arith.constant 3 : index
      %c160_91 = arith.constant 160 : index
      %129 = vector.load %arg8[%c3_90, %c160_91] : memref<8x256xf32, #tpu.memory_space<vmem>>, vector<1x32xf32>
      tpu.vector_store %arg8[%c3_90, %c160_91], %128 {strides = array<i32>} : memref<8x256xf32, #tpu.memory_space<vmem>>, vector<1x32xf32>,
      %c30 = arith.constant 30 : index
      %130 = memref.load %arg1[%c30] : memref<64xi32, #tpu.memory_space<smem>>
      %131 = arith.index_cast %130 : i32 to index
      %c0_92 = arith.constant 0 : index
      %132 = vector.load %arg2[%131, %c0_92] : memref<16x32xf32, #tpu.memory_space<vmem>>, vector<1x32xf32>
      %c3_93 = arith.constant 3 : index
      %c192_94 = arith.constant 192 : index
      %133 = vector.load %arg8[%c3_93, %c192_94] : memref<8x256xf32, #tpu.memory_space<vmem>>, vector<1x32xf32>
      tpu.vector_store %arg8[%c3_93, %c192_94], %132 {strides = array<i32>} : memref<8x256xf32, #tpu.memory_space<vmem>>, vector<1x32xf32>,
      %c31 = arith.constant 31 : index
      %134 = memref.load %arg1[%c31] : memref<64xi32, #tpu.memory_space<smem>>
      %135 = arith.index_cast %134 : i32 to index
      %c0_95 = arith.constant 0 : index
      %136 = vector.load %arg2[%135, %c0_95] : memref<16x32xf32, #tpu.memory_space<vmem>>, vector<1x32xf32>
      %c3_96 = arith.constant 3 : index
      %c224_97 = arith.constant 224 : index
      %137 = vector.load %arg8[%c3_96, %c224_97] : memref<8x256xf32, #tpu.memory_space<vmem>>, vector<1x32xf32>
      tpu.vector_store %arg8[%c3_96, %c224_97], %136 {strides = array<i32>} : memref<8x256xf32, #tpu.memory_space<vmem>>, vector<1x32xf32>,
      %c32_98 = arith.constant 32 : index
      %138 = memref.load %arg1[%c32_98] : memref<64xi32, #tpu.memory_space<smem>>
      %139 = arith.index_cast %138 : i32 to index
      %c0_99 = arith.constant 0 : index
      %140 = vector.load %arg2[%139, %c0_99] : memref<16x32xf32, #tpu.memory_space<vmem>>, vector<1x32xf32>
      %c4_100 = arith.constant 4 : index
      %c0_101 = arith.constant 0 : index
      %141 = vector.load %arg8[%c4_100, %c0_101] : memref<8x256xf32, #tpu.memory_space<vmem>>, vector<1x32xf32>
      tpu.vector_store %arg8[%c4_100, %c0_101], %140 {strides = array<i32>} : memref<8x256xf32, #tpu.memory_space<vmem>>, vector<1x32xf32>,
      %c33 = arith.constant 33 : index
      %142 = memref.load %arg1[%c33] : memref<64xi32, #tpu.memory_space<smem>>
      %143 = arith.index_cast %142 : i32 to index
      %c0_102 = arith.constant 0 : index
      %144 = vector.load %arg2[%143, %c0_102] : memref<16x32xf32, #tpu.memory_space<vmem>>, vector<1x32xf32>
      %c4_103 = arith.constant 4 : index
      %c32_104 = arith.constant 32 : index
      %145 = vector.load %arg8[%c4_103, %c32_104] : memref<8x256xf32, #tpu.memory_space<vmem>>, vector<1x32xf32>
      tpu.vector_store %arg8[%c4_103, %c32_104], %144 {strides = array<i32>} : memref<8x256xf32, #tpu.memory_space<vmem>>, vector<1x32xf32>,
      %c34 = arith.constant 34 : index
      %146 = memref.load %arg1[%c34] : memref<64xi32, #tpu.memory_space<smem>>
      %147 = arith.index_cast %146 : i32 to index
      %c0_105 = arith.constant 0 : index
      %148 = vector.load %arg2[%147, %c0_105] : memref<16x32xf32, #tpu.memory_space<vmem>>, vector<1x32xf32>
      %c4_106 = arith.constant 4 : index
      %c64_107 = arith.constant 64 : index
      %149 = vector.load %arg8[%c4_106, %c64_107] : memref<8x256xf32, #tpu.memory_space<vmem>>, vector<1x32xf32>
      tpu.vector_store %arg8[%c4_106, %c64_107], %148 {strides = array<i32>} : memref<8x256xf32, #tpu.memory_space<vmem>>, vector<1x32xf32>,
      %c35 = arith.constant 35 : index
      %150 = memref.load %arg1[%c35] : memref<64xi32, #tpu.memory_space<smem>>
      %151 = arith.index_cast %150 : i32 to index
      %c0_108 = arith.constant 0 : index
      %152 = vector.load %arg2[%151, %c0_108] : memref<16x32xf32, #tpu.memory_space<vmem>>, vector<1x32xf32>
      %c4_109 = arith.constant 4 : index
      %c96_110 = arith.constant 96 : index
      %153 = vector.load %arg8[%c4_109, %c96_110] : memref<8x256xf32, #tpu.memory_space<vmem>>, vector<1x32xf32>
      tpu.vector_store %arg8[%c4_109, %c96_110], %152 {strides = array<i32>} : memref<8x256xf32, #tpu.memory_space<vmem>>, vector<1x32xf32>,
      %c36 = arith.constant 36 : index
      %154 = memref.load %arg1[%c36] : memref<64xi32, #tpu.memory_space<smem>>
      %155 = arith.index_cast %154 : i32 to index
      %c0_111 = arith.constant 0 : index
      %156 = vector.load %arg2[%155, %c0_111] : memref<16x32xf32, #tpu.memory_space<vmem>>, vector<1x32xf32>
      %c4_112 = arith.constant 4 : index
      %c128_113 = arith.constant 128 : index
      %157 = vector.load %arg8[%c4_112, %c128_113] : memref<8x256xf32, #tpu.memory_space<vmem>>, vector<1x32xf32>
      tpu.vector_store %arg8[%c4_112, %c128_113], %156 {strides = array<i32>} : memref<8x256xf32, #tpu.memory_space<vmem>>, vector<1x32xf32>,
      %c37 = arith.constant 37 : index
      %158 = memref.load %arg1[%c37] : memref<64xi32, #tpu.memory_space<smem>>
      %159 = arith.index_cast %158 : i32 to index
      %c0_114 = arith.constant 0 : index
      %160 = vector.load %arg2[%159, %c0_114] : memref<16x32xf32, #tpu.memory_space<vmem>>, vector<1x32xf32>
      %c4_115 = arith.constant 4 : index
      %c160_116 = arith.constant 160 : index
      %161 = vector.load %arg8[%c4_115, %c160_116] : memref<8x256xf32, #tpu.memory_space<vmem>>, vector<1x32xf32>
      tpu.vector_store %arg8[%c4_115, %c160_116], %160 {strides = array<i32>} : memref<8x256xf32, #tpu.memory_space<vmem>>, vector<1x32xf32>,
      %c38 = arith.constant 38 : index
      %162 = memref.load %arg1[%c38] : memref<64xi32, #tpu.memory_space<smem>>
      %163 = arith.index_cast %162 : i32 to index
      %c0_117 = arith.constant 0 : index
      %164 = vector.load %arg2[%163, %c0_117] : memref<16x32xf32, #tpu.memory_space<vmem>>, vector<1x32xf32>
      %c4_118 = arith.constant 4 : index
      %c192_119 = arith.constant 192 : index
      %165 = vector.load %arg8[%c4_118, %c192_119] : memref<8x256xf32, #tpu.memory_space<vmem>>, vector<1x32xf32>
      tpu.vector_store %arg8[%c4_118, %c192_119], %164 {strides = array<i32>} : memref<8x256xf32, #tpu.memory_space<vmem>>, vector<1x32xf32>,
      %c39 = arith.constant 39 : index
      %166 = memref.load %arg1[%c39] : memref<64xi32, #tpu.memory_space<smem>>
      %167 = arith.index_cast %166 : i32 to index
      %c0_120 = arith.constant 0 : index
      %168 = vector.load %arg2[%167, %c0_120] : memref<16x32xf32, #tpu.memory_space<vmem>>, vector<1x32xf32>
      %c4_121 = arith.constant 4 : index
      %c224_122 = arith.constant 224 : index
      %169 = vector.load %arg8[%c4_121, %c224_122] : memref<8x256xf32, #tpu.memory_space<vmem>>, vector<1x32xf32>
      tpu.vector_store %arg8[%c4_121, %c224_122], %168 {strides = array<i32>} : memref<8x256xf32, #tpu.memory_space<vmem>>, vector<1x32xf32>,
      %c40 = arith.constant 40 : index
      %170 = memref.load %arg1[%c40] : memref<64xi32, #tpu.memory_space<smem>>
      %171 = arith.index_cast %170 : i32 to index
      %c0_123 = arith.constant 0 : index
      %172 = vector.load %arg2[%171, %c0_123] : memref<16x32xf32, #tpu.memory_space<vmem>>, vector<1x32xf32>
      %c5_124 = arith.constant 5 : index
      %c0_125 = arith.constant 0 : index
      %173 = vector.load %arg8[%c5_124, %c0_125] : memref<8x256xf32, #tpu.memory_space<vmem>>, vector<1x32xf32>
      tpu.vector_store %arg8[%c5_124, %c0_125], %172 {strides = array<i32>} : memref<8x256xf32, #tpu.memory_space<vmem>>, vector<1x32xf32>,
      %c41 = arith.constant 41 : index
      %174 = memref.load %arg1[%c41] : memref<64xi32, #tpu.memory_space<smem>>
      %175 = arith.index_cast %174 : i32 to index
      %c0_126 = arith.constant 0 : index
      %176 = vector.load %arg2[%175, %c0_126] : memref<16x32xf32, #tpu.memory_space<vmem>>, vector<1x32xf32>
      %c5_127 = arith.constant 5 : index
      %c32_128 = arith.constant 32 : index
      %177 = vector.load %arg8[%c5_127, %c32_128] : memref<8x256xf32, #tpu.memory_space<vmem>>, vector<1x32xf32>
      tpu.vector_store %arg8[%c5_127, %c32_128], %176 {strides = array<i32>} : memref<8x256xf32, #tpu.memory_space<vmem>>, vector<1x32xf32>,
      %c42 = arith.constant 42 : index
      %178 = memref.load %arg1[%c42] : memref<64xi32, #tpu.memory_space<smem>>
      %179 = arith.index_cast %178 : i32 to index
      %c0_129 = arith.constant 0 : index
      %180 = vector.load %arg2[%179, %c0_129] : memref<16x32xf32, #tpu.memory_space<vmem>>, vector<1x32xf32>
      %c5_130 = arith.constant 5 : index
      %c64_131 = arith.constant 64 : index
      %181 = vector.load %arg8[%c5_130, %c64_131] : memref<8x256xf32, #tpu.memory_space<vmem>>, vector<1x32xf32>
      tpu.vector_store %arg8[%c5_130, %c64_131], %180 {strides = array<i32>} : memref<8x256xf32, #tpu.memory_space<vmem>>, vector<1x32xf32>,
      %c43 = arith.constant 43 : index
      %182 = memref.load %arg1[%c43] : memref<64xi32, #tpu.memory_space<smem>>
      %183 = arith.index_cast %182 : i32 to index
      %c0_132 = arith.constant 0 : index
      %184 = vector.load %arg2[%183, %c0_132] : memref<16x32xf32, #tpu.memory_space<vmem>>, vector<1x32xf32>
      %c5_133 = arith.constant 5 : index
      %c96_134 = arith.constant 96 : index
      %185 = vector.load %arg8[%c5_133, %c96_134] : memref<8x256xf32, #tpu.memory_space<vmem>>, vector<1x32xf32>
      tpu.vector_store %arg8[%c5_133, %c96_134], %184 {strides = array<i32>} : memref<8x256xf32, #tpu.memory_space<vmem>>, vector<1x32xf32>,
      %c44 = arith.constant 44 : index
      %186 = memref.load %arg1[%c44] : memref<64xi32, #tpu.memory_space<smem>>
      %187 = arith.index_cast %186 : i32 to index
      %c0_135 = arith.constant 0 : index
      %188 = vector.load %arg2[%187, %c0_135] : memref<16x32xf32, #tpu.memory_space<vmem>>, vector<1x32xf32>
      %c5_136 = arith.constant 5 : index
      %c128_137 = arith.constant 128 : index
      %189 = vector.load %arg8[%c5_136, %c128_137] : memref<8x256xf32, #tpu.memory_space<vmem>>, vector<1x32xf32>
      tpu.vector_store %arg8[%c5_136, %c128_137], %188 {strides = array<i32>} : memref<8x256xf32, #tpu.memory_space<vmem>>, vector<1x32xf32>,
      %c45 = arith.constant 45 : index
      %190 = memref.load %arg1[%c45] : memref<64xi32, #tpu.memory_space<smem>>
      %191 = arith.index_cast %190 : i32 to index
      %c0_138 = arith.constant 0 : index
      %192 = vector.load %arg2[%191, %c0_138] : memref<16x32xf32, #tpu.memory_space<vmem>>, vector<1x32xf32>
      %c5_139 = arith.constant 5 : index
      %c160_140 = arith.constant 160 : index
      %193 = vector.load %arg8[%c5_139, %c160_140] : memref<8x256xf32, #tpu.memory_space<vmem>>, vector<1x32xf32>
      tpu.vector_store %arg8[%c5_139, %c160_140], %192 {strides = array<i32>} : memref<8x256xf32, #tpu.memory_space<vmem>>, vector<1x32xf32>,
      %c46 = arith.constant 46 : index
      %194 = memref.load %arg1[%c46] : memref<64xi32, #tpu.memory_space<smem>>
      %195 = arith.index_cast %194 : i32 to index
      %c0_141 = arith.constant 0 : index
      %196 = vector.load %arg2[%195, %c0_141] : memref<16x32xf32, #tpu.memory_space<vmem>>, vector<1x32xf32>
      %c5_142 = arith.constant 5 : index
      %c192_143 = arith.constant 192 : index
      %197 = vector.load %arg8[%c5_142, %c192_143] : memref<8x256xf32, #tpu.memory_space<vmem>>, vector<1x32xf32>
      tpu.vector_store %arg8[%c5_142, %c192_143], %196 {strides = array<i32>} : memref<8x256xf32, #tpu.memory_space<vmem>>, vector<1x32xf32>,
      %c47 = arith.constant 47 : index
      %198 = memref.load %arg1[%c47] : memref<64xi32, #tpu.memory_space<smem>>
      %199 = arith.index_cast %198 : i32 to index
      %c0_144 = arith.constant 0 : index
      %200 = vector.load %arg2[%199, %c0_144] : memref<16x32xf32, #tpu.memory_space<vmem>>, vector<1x32xf32>
      %c5_145 = arith.constant 5 : index
      %c224_146 = arith.constant 224 : index
      %201 = vector.load %arg8[%c5_145, %c224_146] : memref<8x256xf32, #tpu.memory_space<vmem>>, vector<1x32xf32>
      tpu.vector_store %arg8[%c5_145, %c224_146], %200 {strides = array<i32>} : memref<8x256xf32, #tpu.memory_space<vmem>>, vector<1x32xf32>,
      %c48 = arith.constant 48 : index
      %202 = memref.load %arg1[%c48] : memref<64xi32, #tpu.memory_space<smem>>
      %203 = arith.index_cast %202 : i32 to index
      %c0_147 = arith.constant 0 : index
      %204 = vector.load %arg2[%203, %c0_147] : memref<16x32xf32, #tpu.memory_space<vmem>>, vector<1x32xf32>
      %c6_148 = arith.constant 6 : index
      %c0_149 = arith.constant 0 : index
      %205 = vector.load %arg8[%c6_148, %c0_149] : memref<8x256xf32, #tpu.memory_space<vmem>>, vector<1x32xf32>
      tpu.vector_store %arg8[%c6_148, %c0_149], %204 {strides = array<i32>} : memref<8x256xf32, #tpu.memory_space<vmem>>, vector<1x32xf32>,
      %c49 = arith.constant 49 : index
      %206 = memref.load %arg1[%c49] : memref<64xi32, #tpu.memory_space<smem>>
      %207 = arith.index_cast %206 : i32 to index
      %c0_150 = arith.constant 0 : index
      %208 = vector.load %arg2[%207, %c0_150] : memref<16x32xf32, #tpu.memory_space<vmem>>, vector<1x32xf32>
      %c6_151 = arith.constant 6 : index
      %c32_152 = arith.constant 32 : index
      %209 = vector.load %arg8[%c6_151, %c32_152] : memref<8x256xf32, #tpu.memory_space<vmem>>, vector<1x32xf32>
      tpu.vector_store %arg8[%c6_151, %c32_152], %208 {strides = array<i32>} : memref<8x256xf32, #tpu.memory_space<vmem>>, vector<1x32xf32>,
      %c50 = arith.constant 50 : index
      %210 = memref.load %arg1[%c50] : memref<64xi32, #tpu.memory_space<smem>>
      %211 = arith.index_cast %210 : i32 to index
      %c0_153 = arith.constant 0 : index
      %212 = vector.load %arg2[%211, %c0_153] : memref<16x32xf32, #tpu.memory_space<vmem>>, vector<1x32xf32>
      %c6_154 = arith.constant 6 : index
      %c64_155 = arith.constant 64 : index
      %213 = vector.load %arg8[%c6_154, %c64_155] : memref<8x256xf32, #tpu.memory_space<vmem>>, vector<1x32xf32>
      tpu.vector_store %arg8[%c6_154, %c64_155], %212 {strides = array<i32>} : memref<8x256xf32, #tpu.memory_space<vmem>>, vector<1x32xf32>,
      %c51 = arith.constant 51 : index
      %214 = memref.load %arg1[%c51] : memref<64xi32, #tpu.memory_space<smem>>
      %215 = arith.index_cast %214 : i32 to index
      %c0_156 = arith.constant 0 : index
      %216 = vector.load %arg2[%215, %c0_156] : memref<16x32xf32, #tpu.memory_space<vmem>>, vector<1x32xf32>
      %c6_157 = arith.constant 6 : index
      %c96_158 = arith.constant 96 : index
      %217 = vector.load %arg8[%c6_157, %c96_158] : memref<8x256xf32, #tpu.memory_space<vmem>>, vector<1x32xf32>
      tpu.vector_store %arg8[%c6_157, %c96_158], %216 {strides = array<i32>} : memref<8x256xf32, #tpu.memory_space<vmem>>, vector<1x32xf32>,
      %c52 = arith.constant 52 : index
      %218 = memref.load %arg1[%c52] : memref<64xi32, #tpu.memory_space<smem>>
      %219 = arith.index_cast %218 : i32 to index
      %c0_159 = arith.constant 0 : index
      %220 = vector.load %arg2[%219, %c0_159] : memref<16x32xf32, #tpu.memory_space<vmem>>, vector<1x32xf32>
      %c6_160 = arith.constant 6 : index
      %c128_161 = arith.constant 128 : index
      %221 = vector.load %arg8[%c6_160, %c128_161] : memref<8x256xf32, #tpu.memory_space<vmem>>, vector<1x32xf32>
      tpu.vector_store %arg8[%c6_160, %c128_161], %220 {strides = array<i32>} : memref<8x256xf32, #tpu.memory_space<vmem>>, vector<1x32xf32>,
      %c53 = arith.constant 53 : index
      %222 = memref.load %arg1[%c53] : memref<64xi32, #tpu.memory_space<smem>>
      %223 = arith.index_cast %222 : i32 to index
      %c0_162 = arith.constant 0 : index
      %224 = vector.load %arg2[%223, %c0_162] : memref<16x32xf32, #tpu.memory_space<vmem>>, vector<1x32xf32>
      %c6_163 = arith.constant 6 : index
      %c160_164 = arith.constant 160 : index
      %225 = vector.load %arg8[%c6_163, %c160_164] : memref<8x256xf32, #tpu.memory_space<vmem>>, vector<1x32xf32>
      tpu.vector_store %arg8[%c6_163, %c160_164], %224 {strides = array<i32>} : memref<8x256xf32, #tpu.memory_space<vmem>>, vector<1x32xf32>,
      %c54 = arith.constant 54 : index
      %226 = memref.load %arg1[%c54] : memref<64xi32, #tpu.memory_space<smem>>
      %227 = arith.index_cast %226 : i32 to index
      %c0_165 = arith.constant 0 : index
      %228 = vector.load %arg2[%227, %c0_165] : memref<16x32xf32, #tpu.memory_space<vmem>>, vector<1x32xf32>
      %c6_166 = arith.constant 6 : index
      %c192_167 = arith.constant 192 : index
      %229 = vector.load %arg8[%c6_166, %c192_167] : memref<8x256xf32, #tpu.memory_space<vmem>>, vector<1x32xf32>
      tpu.vector_store %arg8[%c6_166, %c192_167], %228 {strides = array<i32>} : memref<8x256xf32, #tpu.memory_space<vmem>>, vector<1x32xf32>,
      %c55 = arith.constant 55 : index
      %230 = memref.load %arg1[%c55] : memref<64xi32, #tpu.memory_space<smem>>
      %231 = arith.index_cast %230 : i32 to index
      %c0_168 = arith.constant 0 : index
      %232 = vector.load %arg2[%231, %c0_168] : memref<16x32xf32, #tpu.memory_space<vmem>>, vector<1x32xf32>
      %c6_169 = arith.constant 6 : index
      %c224_170 = arith.constant 224 : index
      %233 = vector.load %arg8[%c6_169, %c224_170] : memref<8x256xf32, #tpu.memory_space<vmem>>, vector<1x32xf32>
      tpu.vector_store %arg8[%c6_169, %c224_170], %232 {strides = array<i32>} : memref<8x256xf32, #tpu.memory_space<vmem>>, vector<1x32xf32>,
      %c56 = arith.constant 56 : index
      %234 = memref.load %arg1[%c56] : memref<64xi32, #tpu.memory_space<smem>>
      %235 = arith.index_cast %234 : i32 to index
      %c0_171 = arith.constant 0 : index
      %236 = vector.load %arg2[%235, %c0_171] : memref<16x32xf32, #tpu.memory_space<vmem>>, vector<1x32xf32>
      %c7_172 = arith.constant 7 : index
      %c0_173 = arith.constant 0 : index
      %237 = vector.load %arg8[%c7_172, %c0_173] : memref<8x256xf32, #tpu.memory_space<vmem>>, vector<1x32xf32>
      tpu.vector_store %arg8[%c7_172, %c0_173], %236 {strides = array<i32>} : memref<8x256xf32, #tpu.memory_space<vmem>>, vector<1x32xf32>,
      %c57 = arith.constant 57 : index
      %238 = memref.load %arg1[%c57] : memref<64xi32, #tpu.memory_space<smem>>
      %239 = arith.index_cast %238 : i32 to index
      %c0_174 = arith.constant 0 : index
      %240 = vector.load %arg2[%239, %c0_174] : memref<16x32xf32, #tpu.memory_space<vmem>>, vector<1x32xf32>
      %c7_175 = arith.constant 7 : index
      %c32_176 = arith.constant 32 : index
      %241 = vector.load %arg8[%c7_175, %c32_176] : memref<8x256xf32, #tpu.memory_space<vmem>>, vector<1x32xf32>
      tpu.vector_store %arg8[%c7_175, %c32_176], %240 {strides = array<i32>} : memref<8x256xf32, #tpu.memory_space<vmem>>, vector<1x32xf32>,
      %c58 = arith.constant 58 : index
      %242 = memref.load %arg1[%c58] : memref<64xi32, #tpu.memory_space<smem>>
      %243 = arith.index_cast %242 : i32 to index
      %c0_177 = arith.constant 0 : index
      %244 = vector.load %arg2[%243, %c0_177] : memref<16x32xf32, #tpu.memory_space<vmem>>, vector<1x32xf32>
      %c7_178 = arith.constant 7 : index
      %c64_179 = arith.constant 64 : index
      %245 = vector.load %arg8[%c7_178, %c64_179] : memref<8x256xf32, #tpu.memory_space<vmem>>, vector<1x32xf32>
      tpu.vector_store %arg8[%c7_178, %c64_179], %244 {strides = array<i32>} : memref<8x256xf32, #tpu.memory_space<vmem>>, vector<1x32xf32>,
      %c59 = arith.constant 59 : index
      %246 = memref.load %arg1[%c59] : memref<64xi32, #tpu.memory_space<smem>>
      %247 = arith.index_cast %246 : i32 to index
      %c0_180 = arith.constant 0 : index
      %248 = vector.load %arg2[%247, %c0_180] : memref<16x32xf32, #tpu.memory_space<vmem>>, vector<1x32xf32>
      %c7_181 = arith.constant 7 : index
      %c96_182 = arith.constant 96 : index
      %249 = vector.load %arg8[%c7_181, %c96_182] : memref<8x256xf32, #tpu.memory_space<vmem>>, vector<1x32xf32>
      tpu.vector_store %arg8[%c7_181, %c96_182], %248 {strides = array<i32>} : memref<8x256xf32, #tpu.memory_space<vmem>>, vector<1x32xf32>,
      %c60 = arith.constant 60 : index
      %250 = memref.load %arg1[%c60] : memref<64xi32, #tpu.memory_space<smem>>
      %251 = arith.index_cast %250 : i32 to index
      %c0_183 = arith.constant 0 : index
      %252 = vector.load %arg2[%251, %c0_183] : memref<16x32xf32, #tpu.memory_space<vmem>>, vector<1x32xf32>
      %c7_184 = arith.constant 7 : index
      %c128_185 = arith.constant 128 : index
      %253 = vector.load %arg8[%c7_184, %c128_185] : memref<8x256xf32, #tpu.memory_space<vmem>>, vector<1x32xf32>
      tpu.vector_store %arg8[%c7_184, %c128_185], %252 {strides = array<i32>} : memref<8x256xf32, #tpu.memory_space<vmem>>, vector<1x32xf32>,
      %c61 = arith.constant 61 : index
      %254 = memref.load %arg1[%c61] : memref<64xi32, #tpu.memory_space<smem>>
      %255 = arith.index_cast %254 : i32 to index
      %c0_186 = arith.constant 0 : index
      %256 = vector.load %arg2[%255, %c0_186] : memref<16x32xf32, #tpu.memory_space<vmem>>, vector<1x32xf32>
      %c7_187 = arith.constant 7 : index
      %c160_188 = arith.constant 160 : index
      %257 = vector.load %arg8[%c7_187, %c160_188] : memref<8x256xf32, #tpu.memory_space<vmem>>, vector<1x32xf32>
      tpu.vector_store %arg8[%c7_187, %c160_188], %256 {strides = array<i32>} : memref<8x256xf32, #tpu.memory_space<vmem>>, vector<1x32xf32>,
      %c62 = arith.constant 62 : index
      %258 = memref.load %arg1[%c62] : memref<64xi32, #tpu.memory_space<smem>>
      %259 = arith.index_cast %258 : i32 to index
      %c0_189 = arith.constant 0 : index
      %260 = vector.load %arg2[%259, %c0_189] : memref<16x32xf32, #tpu.memory_space<vmem>>, vector<1x32xf32>
      %c7_190 = arith.constant 7 : index
      %c192_191 = arith.constant 192 : index
      %261 = vector.load %arg8[%c7_190, %c192_191] : memref<8x256xf32, #tpu.memory_space<vmem>>, vector<1x32xf32>
      tpu.vector_store %arg8[%c7_190, %c192_191], %260 {strides = array<i32>} : memref<8x256xf32, #tpu.memory_space<vmem>>, vector<1x32xf32>,
      %c63 = arith.constant 63 : index
      %262 = memref.load %arg1[%c63] : memref<64xi32, #tpu.memory_space<smem>>
      %263 = arith.index_cast %262 : i32 to index
      %c0_192 = arith.constant 0 : index
      %264 = vector.load %arg2[%263, %c0_192] : memref<16x32xf32, #tpu.memory_space<vmem>>, vector<1x32xf32>
      %c7_193 = arith.constant 7 : index
      %c224_194 = arith.constant 224 : index
      %265 = vector.load %arg8[%c7_193, %c224_194] : memref<8x256xf32, #tpu.memory_space<vmem>>, vector<1x32xf32>
      tpu.vector_store %arg8[%c7_193, %c224_194], %264 {strides = array<i32>} : memref<8x256xf32, #tpu.memory_space<vmem>>, vector<1x32xf32>,
      %c0_195 = arith.constant 0 : index
      %c0_196 = arith.constant 0 : index
      %266 = vector.load %arg8[%c0_195, %c0_196] : memref<8x256xf32, #tpu.memory_space<vmem>>, vector<8x256xf32>
      %267 = arith.truncf %266 : vector<8x256xf32> to vector<8x256xbf16>
      %c0_197 = arith.constant 0 : index
      %c0_198 = arith.constant 0 : index
      %268 = vector.load %arg3[%c0_197, %c0_198] : memref<256x128xbf16, #tpu.memory_space<vmem>>, vector<256x128xbf16>
      %cst_199 = arith.constant dense<0.000000e+00> : vector<8x128xf32>
      %269 = tpu.matmul %267, %268, %cst_199 {dimension_numbers = #tpu.dot_dimension_numbers<[1], [0], [0], [1], [0, 0, 1, 1], [], []>} : vector<8x256xbf16>, vector<256x128xbf16>, vector<8x128xf32> -> vector<8x128xf32>
      %c0_200 = arith.constant 0 : index
      %c0_201 = arith.constant 0 : index
      %270 = vector.load %arg4[%c0_200, %c0_201] : memref<1x128xf32, #tpu.memory_space<vmem>>, vector<1x128xf32>
      %271 = vector.broadcast %270 : vector<1x128xf32> to vector<8x128xf32>
      %272 = arith.addf %269, %271 : vector<8x128xf32>
      %cst_202 = arith.constant 0.000000e+00 : f32
      %273 = vector.broadcast %cst_202 : f32 to vector<8x128xf32>
      %274 = arith.maximumf %272, %273 : vector<8x128xf32>
      %275 = arith.truncf %274 : vector<8x128xf32> to vector<8x128xbf16>
      %c0_203 = arith.constant 0 : index
      %c0_204 = arith.constant 0 : index
      %276 = vector.load %arg9[%c0_203, %c0_204] : memref<8x128xbf16, #tpu.memory_space<vmem>>, vector<8x128xbf16>
      tpu.vector_store %arg9[%c0_203, %c0_204], %275 {strides = array<i32>} : memref<8x128xbf16, #tpu.memory_space<vmem>>, vector<8x128xbf16>,
    } else {
    }
    %c0 = arith.constant 0 : index
    %c0_1 = arith.constant 0 : index
    %3 = vector.load %arg9[%c0, %c0_1] : memref<8x128xbf16, #tpu.memory_space<vmem>>, vector<8x128xbf16>
    %c0_2 = arith.constant 0 : index
    %c0_3 = arith.constant 0 : index
    %4 = vector.load %arg5[%c0_2, %c0_3] : memref<128x128xbf16, #tpu.memory_space<vmem>>, vector<128x128xbf16>
    %cst = arith.constant dense<0.000000e+00> : vector<8x128xf32>
    %5 = tpu.matmul %3, %4, %cst {dimension_numbers = #tpu.dot_dimension_numbers<[1], [0], [0], [1], [0, 0, 1, 1], [], []>} : vector<8x128xbf16>, vector<128x128xbf16>, vector<8x128xf32> -> vector<8x128xf32>
    %c0_4 = arith.constant 0 : index
    %c0_5 = arith.constant 0 : index
    %6 = vector.load %arg6[%c0_4, %c0_5] : memref<1x128xf32, #tpu.memory_space<vmem>>, vector<1x128xf32>
    %7 = vector.broadcast %6 : vector<1x128xf32> to vector<8x128xf32>
    %8 = arith.addf %5, %7 : vector<8x128xf32>
    %c0_6 = arith.constant 0 : index
    %c0_7 = arith.constant 0 : index
    %9 = vector.load %arg7[%c0_6, %c0_7] : memref<8x128xf32, #tpu.memory_space<vmem>>, vector<8x128xf32>
    tpu.vector_store %arg7[%c0_6, %c0_7], %8 {strides = array<i32>} : memref<8x128xf32, #tpu.memory_space<vmem>>, vector<8x128xf32>,
    return
  }
  func.func @transform_0(%arg0: i32, %arg1: memref<64xi32, #tpu.memory_space<smem>>) -> (i32, i32) {
    %c0_i32 = arith.constant 0 : i32
    %c0_i32_0 = arith.constant 0 : i32
    %c0_i32_1 = arith.constant 0 : i32
    return %c0_i32, %c0_i32_0 : i32, i32
  }
  func.func @transform_1(%arg0: i32, %arg1: memref<64xi32, #tpu.memory_space<smem>>) -> (i32, i32) {
    %c0_i32 = arith.constant 0 : i32
    %c0_i32_0 = arith.constant 0 : i32
    %c0_i32_1 = arith.constant 0 : i32
    return %c0_i32, %c0_i32_0 : i32, i32
  }
  func.func @transform_2(%arg0: i32, %arg1: memref<64xi32, #tpu.memory_space<smem>>) -> (i32, i32) {
    %c0_i32 = arith.constant 0 : i32
    %c0_i32_0 = arith.constant 0 : i32
    %c0_i32_1 = arith.constant 0 : i32
    return %c0_i32, %c0_i32_0 : i32, i32
  }
  func.func @transform_3(%arg0: i32, %arg1: memref<64xi32, #tpu.memory_space<smem>>) -> (i32, i32) {
    %c0_i32 = arith.constant 0 : i32
    %c0_i32_0 = arith.constant 0 : i32
    return %c0_i32, %arg0 : i32, i32
  }
  func.func @transform_4(%arg0: i32, %arg1: memref<64xi32, #tpu.memory_space<smem>>) -> (i32, i32) {
    %c0_i32 = arith.constant 0 : i32
    %c0_i32_0 = arith.constant 0 : i32
    return %c0_i32, %arg0 : i32, i32
  }
  func.func @transform_5(%arg0: i32, %arg1: memref<64xi32, #tpu.memory_space<smem>>) -> (i32, i32) {
    %c0_i32 = arith.constant 0 : i32
    %c0_i32_0 = arith.constant 0 : i32
    return %c0_i32, %arg0 : i32, i32
  }
}

</mosaic_0001>

<bundles_post_ra>
// kernel: tpu_custom_call.1
= control target key start
LH: loop header
LB: loop body
LE: loop exit
PB: predicated region body
PF: predicated region fallthrough
CT: control target
= control target key end

     0   :  { %s1540_s0 = inlined_call_operand.hbm [shape: s32[64], index: 0, kind: input, shape index: {}]   ;;  %s1541_s1 = inlined_call_operand.hbm [shape: f32[16,32], index: 1, kind: input, shape index: {}]   ;;  %s1542_s2 = inlined_call_operand.hbm [shape: bf16[256,128], index: 2, kind: input, shape index: {}]   ;;  %s1543_s3 = inlined_call_operand.vmem [shape: f32[1,128], index: 3, kind: input, shape index: {}]   ;;  %s1544_s4 = inlined_call_operand.hbm [shape: bf16[128,128], index: 4, kind: input, shape index: {}]   ;;  %s1545_s5 = inlined_call_operand.vmem [shape: f32[1,128], index: 5, kind: input, shape index: {}]   ;;  %s1546_s6 = inlined_call_operand.hbm [shape: f32[8,128], index: 6, kind: output, shape index: {}]  }
   0x1   :  { %1550 = sst [smem:[#allocation18_spill]] %s1543_s3  ;;  %s1076_s23 = scalar_lea.hbm %s1540_s0, 16 }
   0x2   :  { %1551 = sst [smem:[#allocation19_spill]] %s1545_s5  ;;  %p1077_p0 = scmp.ne.s32.totalorder %s1540_s0, %s1076_s23 }
   0x3   :  { %1552 = sst [smem:[#allocation20_spill]] %s1546_s6  ;;  %p1080_p1 = scmp.lt.u32.totalorder %s1076_s23, %s1540_s0 }
   0x5   :  { %p1082_p2 = pnand %p1080_p1, %p1077_p0 }
   0x7   :  { %1085 = shalt.err (!%p1082_p2)  }
   0x8   :  { %s1182_s28 = smov [#allocation5]  }
   0x9   :  { %12 = dma.hbm_to_smem %s1540_s0, 16, %s1182_s28, [#allocation4] }
   0xa   :  { %1174 = dma.done.wait [#allocation4], 16 }
   0xb   :  { %1175 = vsyncadd [#allocation4], 4294967280 }
   0xc   :  { %14 = sfence }
   0xd   :  { %15 = vsyncpa [#allocation7], 0 }
   0xe   :  { %16 = vsyncpa [#allocation10], 0 }
   0xf   :  { %17 = vsyncpa [#allocation8], 0  ;;  %s1183_s7 = smov [#allocation9]   ;;  %s1086_s11 = scalar_lea.hbm %s1542_s2, 2048 }
  0x10   :  { %s35_s8 = sshll.u32 %s1183_s7, 4  ;;  %p1087_p3 = scmp.ne.s32.totalorder %s1542_s2, %s1086_s11  ;;  %s36_s8 = int_to_ptr.vmem [resolvable:$true] %s35_s8 }
  0x11   :  { %p1090_p4 = scmp.lt.u32.totalorder %s1086_s11, %s1542_s2 }
  0x13   :  { %p1092_p5 = pnand %p1090_p4, %p1087_p3 }
  0x15   :  { %1095 = shalt.err (!%p1092_p5)
}
  0x16   :  { %s1096_s0 = scalar_lea.vmem %s36_s8, 2048  ;;  %p1101_p7 = scmp.lt.s32.totalorder %s36_s8, %s36_s8 }
  0x17   :  { %p1097_p6 = scmp.ne.s32.totalorder %s36_s8, %s1096_s0  ;;  %p1102_p8 = scmp.lt.s32.totalorder %s1096_s0, %s1096_s0 }
  0x19   :  { %p1103_p9 = por %p1102_p8, %p1101_p7 }
  0x1b   :  { %p1104_p10 = pnand %p1103_p9, %p1097_p6 }
  0x1d   :  { %1107 = shalt.err (!%p1104_p10)
}
  0x1e   :  { %s1548_s16 = smov 64   ;;  %s1185_s17 = smov 4  }
  0x1f   :  { %41 = dma.hbm_to_vmem [thread:$0]  %s1542_s2, 2048, %s36_s8, [#allocation10], %s1548_s16, %s1548_s16, %s1185_s17  }
  0x20   :  { %s1186_s20 = smov [#allocation6]   ;;  %s1108_s24 = scalar_lea.hbm %s1541_s1, 256 }
  0x21   :  { %s23_s21 = sshll.u32 %s1186_s20, 4  ;;  %p1109_p11 = scmp.ne.s32.totalorder %s1541_s1, %s1108_s24  ;;  %s24_s21 = int_to_ptr.vmem [resolvable:$true] %s23_s21 }
  0x22   :  { %p1112_p12 = scmp.lt.u32.totalorder %s1108_s24, %s1541_s1 }
  0x24   :  { %p1114_p13 = pnand %p1112_p12, %p1109_p11 }
  0x26   :  { %1117 = shalt.err (!%p1114_p13)
}
  0x27   :  { %s1118_s29 = scalar_lea.vmem %s24_s21, 256  ;;  %p1123_p1 = scmp.lt.s32.totalorder %s24_s21, %s24_s21 }
  0x28   :  { %p1119_p0 = scmp.ne.s32.totalorder %s24_s21, %s1118_s29  ;;  %p1124_p2 = scmp.lt.s32.totalorder %s1118_s29, %s1118_s29 }
  0x2a   :  { %p1125_p3 = por %p1124_p2, %p1123_p1 }
  0x2c   :  { %p1126_p4 = pnand %p1125_p3, %p1119_p0 }
  0x2e   :  { %1129 = shalt.err (!%p1126_p4)
}
  0x2f   :  { %s1187_s2 = smov 128   ;;  %s1188_s30 = smov 8  }
  0x30   :  { %29 = dma.hbm_to_vmem [thread:$0]  %s1541_s1, 256, %s24_s21, [#allocation7], %s1187_s2, %s1187_s2, %s1188_s30  }
  0x31   :  { %s1189_s9 = smov [#allocation11]   ;;  %s1130_s13 = scalar_lea.hbm %s1544_s4, 1024 }
  0x32   :  { %s49_s10 = sshll.u32 %s1189_s9, 4  ;;  %p1131_p5 = scmp.ne.s32.totalorder %s1544_s4, %s1130_s13  ;;  %s50_s10 = int_to_ptr.vmem [resolvable:$true] %s49_s10 }
  0x33   :  { %p1134_p6 = scmp.lt.u32.totalorder %s1130_s13, %s1544_s4 }
  0x35   :  { %p1136_p7 = pnand %p1134_p6, %p1131_p5 }
  0x37   :  { %1139 = shalt.err (!%p1136_p7)
}
  0x38   :  { %s1140_s19 = scalar_lea.vmem %s50_s10, 1024  ;;  %p1145_p9 = scmp.lt.s32.totalorder %s50_s10, %s50_s10 }
  0x39   :  { %p1141_p8 = scmp.ne.s32.totalorder %s50_s10, %s1140_s19  ;;  %p1146_p10 = scmp.lt.s32.totalorder %s1140_s19, %s1140_s19 }
  0x3b   :  { %p1147_p11 = por %p1146_p10, %p1145_p9 }
  0x3d   :  { %p1148_p12 = pnand %p1147_p11, %p1141_p8 }
  0x3f   :  { %1151 = shalt.err (!%p1148_p12)
}
  0x40   :  { %55 = dma.hbm_to_vmem [thread:$0]  %s1544_s4, 1024, %s50_s10, [#allocation10], %s1548_s16, %s1548_s16, %s1185_s17  }
  0x41   :  { %1176 = dma.done.wait [#allocation7], 256  }
  0x42   :  { %1177 = vsyncadd [#allocation7], 4294967040 }
  0x43   :  { %1178 = dma.done.wait [#allocation10], 3072  }
  0x44   :  { %1179 = vsyncadd [#allocation10], 4294964224  ;;  %s919_s21 = sld [smem:[#allocation5 + $0x15]]  ;;  %s1190_s30 = smov 32   ;;  %vm75_vm0 = vcmask 253952   ;;  %v1052_v44 = vld [vmem:[#allocation9 + $0x40] sm:$0xff]  }
  0x45   :  { %s903_s22 = sld [smem:[#allocation5 + $0x5]]  ;;  %s904_s4 = sld [smem:[#allocation5 + $0x6]]  ;;  %v1053_v45 = vld [vmem:[#allocation9] sm:$0xff]   ;;  %988 = vmatprep.subr.bf16.mxu0 %v1052_v44  ;;  %v1054_v48 = vld [vmem:[#allocation9 + $0x48] sm:$0xff]   ;;  %v1056_v56 = vld [vmem:[#allocation9 + $0x50] sm:$0xff]   ;;  %vm84_vm1 = vcmask 516352  }
  0x46   :  { %s927_s23 = sld [smem:[#allocation5 + $0x1d]]  ;;  %s899_s8 = sld [smem:[#allocation5 + $0x1]]  ;;  %989 = vmatpush3.bf16.msra.mxu0 %v1053_v45  ;;  %v1055_v49 = vld [vmem:[#allocation9 + $0x8] sm:$0xff]   ;;  %v1057_v57 = vld [vmem:[#allocation9 + $0x10] sm:$0xff]   ;;  %v1058_v58 = vld [vmem:[#allocation9 + $0x58] sm:$0xff]   ;;  %vm93_vm2 = vcmask 778752  }
  0x47   :  { %s911_s24 = sld [smem:[#allocation5 + $0xd]]  ;;  %s912_s9 = sld [smem:[#allocation5 + $0xe]]  ;;  %990 = vmatprep.subr.bf16.mxu0 %v1054_v48  ;;  %v1059_v59 = vld [vmem:[#allocation9 + $0x18] sm:$0xff]   ;;  %v1060_v62 = vld [vmem:[#allocation9 + $0x60] sm:$0xff]   ;;  %vm102_vm3 = vcmask 1041152   ;;  %vm1193_vm4 = vmmov 0  }
  0x48   :  { %s943_s25 = sld [smem:[#allocation5 + $0x2d]]  ;;  %s907_s10 = sld [smem:[#allocation5 + $0x9]]  ;;  %v1061_v63 = vld [vmem:[#allocation9 + $0x20] sm:$0xff]  }
  0x49   :  { %s935_s26 = sld [smem:[#allocation5 + $0x25]]  ;;  %s920_s15 = sld [smem:[#allocation5 + $0x16]] }
  0x4a   :  { %s959_s27 = sld [smem:[#allocation5 + $0x3d]]  ;;  %s221_s29 = scalar_lea.vmem [#allocation6], %s919_s21  ;;  %991 = vmatpush3.bf16.msra.mxu0 %v1055_v49 }
  0x4b   :  { %s951_s28 = sld [smem:[#allocation5 + $0x35]]  ;;  %v222_v0 = vld [vmem:[%s221_s29] sm:$0x1]  ;;  %s109_s2 = scalar_lea.vmem [#allocation6], %s903_s22  ;;  %992 = vmatprep.subr.bf16.mxu0 %v1056_v56 }
  0x4c   :  { %v110_v1 = vld [vmem:[%s109_s2] sm:$0x1]  ;;  %224 = vrot.lane.b32.xlu1 %v222_v0, %s1190_s30  ;;  %s277_s17 = scalar_lea.vmem [#allocation6], %s927_s23  ;;  %s915_s0 = sld [smem:[#allocation5 + $0x11]] }
  0x4d   :  { %112 = vrot.lane.b32.xlu0 %v110_v1, %s1190_s30  ;;  %v278_v2 = vld [vmem:[%s277_s17] sm:$0x1]  ;;  %s165_s7 = scalar_lea.vmem [#allocation6], %s911_s24  ;;  %s117_s18 = scalar_lea.vmem [#allocation6], %s904_s4 }
  0x4e   :  { %v166_v3 = vld [vmem:[%s165_s7] sm:$0x1]  ;;  %s389_s11 = scalar_lea.vmem [#allocation6], %s943_s25  ;;  %s78_s19 = scalar_lea.vmem [#allocation6], %s899_s8  ;;  %993 = vmatpush3.bf16.msra.mxu0 %v1057_v57 }
  0x4f   :  { %v390_v4 = vld [vmem:[%s389_s11] sm:$0x1]  ;;  %s333_s12 = scalar_lea.vmem [#allocation6], %s935_s26  ;;  %s928_s1 = sld [smem:[#allocation5 + $0x1e]]  ;;  %994 = vmatprep.subr.bf16.mxu0 %v1058_v58 }
  0x50   :  { %280 = vrot.lane.b32.xlu1 %v278_v2, %s1190_s30  ;;  %v334_v5 = vld [vmem:[%s333_s12] sm:$0x1]  ;;  %s501_s13 = scalar_lea.vmem [#allocation6], %s959_s27  ;;  %s923_s20 = sld [smem:[#allocation5 + $0x19]]  ;;  %v1062_v2 = vld [vmem:[#allocation9 + $0x68] sm:$0xff]  }
  0x51   :  { %168 = vrot.lane.b32.xlu0 %v166_v3, %s1190_s30  ;;  %v502_v6 = vld [vmem:[%s501_s13] sm:$0x1]  ;;  %s445_s14 = scalar_lea.vmem [#allocation6], %s951_s28  ;;  %s173_s21 = scalar_lea.vmem [#allocation6], %s912_s9  ;;  %v1063_v3 = vld [vmem:[#allocation9 + $0x28] sm:$0xff]  }
  0x52   :  { %v446_v7 = vld [vmem:[%s445_s14] sm:$0x1]  ;;  %s936_s22 = sld [smem:[#allocation5 + $0x26]]  ;;  %s1294_s23 = sld [smem:[#allocation5 + $0x21]]  ;;  %995 = vmatpush3.bf16.msra.mxu0 %v1059_v59 }
  0x53   :  { %v118_v8 = vld [vmem:[%s117_s18] sm:$0x1]  ;;  %s137_s24 = scalar_lea.vmem [#allocation6], %s907_s10  ;;  %s1296_s25 = sld [smem:[#allocation5 + $0x2e]]  ;;  %996 = vmatprep.subr.bf16.mxu0 %v1060_v62 }
  0x54   :  { %392 = vrot.lane.b32.xlu1 %v390_v4, %s1190_s30  ;;  %v79_v9 = vld [vmem:[%s78_s19] sm:$0x1]  ;;  %s1298_s26 = sld [smem:[#allocation5 + $0x29]]  ;;  %s1302_s27 = sld [smem:[#allocation5 + $0x36]] }
  0x55   :  { %336 = vrot.lane.b32.xlu0 %v334_v5, %s1190_s30  ;;  %v174_v10 = vld [vmem:[%s173_s21] sm:$0x1]  ;;  %s1304_s28 = sld [smem:[#allocation5 + $0x31]]  ;;  %s229_s29 = scalar_lea.vmem [#allocation6], %s920_s15 }
  0x56   :  { %v138_v11 = vld [vmem:[%s137_s24] sm:$0x1]  ;;  %s193_s2 = scalar_lea.vmem [#allocation6], %s915_s0  ;;  %s1306_s4 = sld [smem:[#allocation5 + $0x3e]]  ;;  %997 = vmatpush3.bf16.msra.mxu0 %v1061_v63 }
  0x57   :  { %v230_v12 = vld [vmem:[%s229_s29] sm:$0x1]  ;;  %s1310_s17 = sld [smem:[#allocation5 + $0x39]]  ;;  %s285_s7 = scalar_lea.vmem [#allocation6], %s928_s1  ;;  %998 = vmatprep.subr.bf16.mxu0 %v1062_v2 }
  0x58   :  { %504 = vrot.lane.b32.xlu1 %v502_v6, %s1190_s30  ;;  %v194_v13 = vld [vmem:[%s193_s2] sm:$0x1]  ;;  %s249_s8 = scalar_lea.vmem [#allocation6], %s923_s20  ;;  %s1312_s9 = sld [smem:[#allocation5 + $0x7]]  ;;  %v1064_v6 = vld [vmem:[#allocation9 + $0x70] sm:$0xff]  }
  0x59   :  { %448 = vrot.lane.b32.xlu0 %v446_v7, %s1190_s30  ;;  %v286_v14 = vld [vmem:[%s285_s7] sm:$0x1]  ;;  %s1314_s10 = sld [smem:[#allocation5 + $0x2]]  ;;  %s1316_s11 = sld [smem:[#allocation5 + $0xf]]  ;;  %v1065_v7 = vld [vmem:[#allocation9 + $0x30] sm:$0xff]  }
  0x5a   :  { %v250_v15 = vld [vmem:[%s249_s8] sm:$0x1]  ;;  %s341_s12 = scalar_lea.vmem [#allocation6], %s936_s22  ;;  %s1320_s13 = sld [smem:[#allocation5 + $0xa]]  ;;  %999 = vmatpush3.bf16.msra.mxu0 %v1063_v3 }
  0x5b   :  { %v342_v16 = vld [vmem:[%s341_s12] sm:$0x1]  ;;  %s1322_s14 = sld [smem:[#allocation5 + $0x17]]  ;;  %s305_s15 = scalar_lea.vmem [#allocation6], %s1294_s23  ;;  %1000 = vmatprep.subr.bf16.mxu0 %v1064_v6 }
  0x5c   :  { %120 = vrot.lane.b32.xlu1 %v118_v8, %s1548_s16  ;;  %v306_v17 = vld [vmem:[%s305_s15] sm:$0x1]  ;;  %s1325_s0 = sld [smem:[#allocation5 + $0x12]]  ;;  %s1327_s18 = sld [smem:[#allocation5 + $0x1f]] }
  0x5d   :  { %81 = vrot.lane.b32.xlu0 %v79_v9, %s1190_s30  ;;  %s1329_s19 = sld [smem:[#allocation5 + $0x1a]]  ;;  %s1331_s1 = sld [smem:[#allocation5 + $0x27]]  ;;  %v1066_v8 = vld [vmem:[#allocation9 + $0x78] sm:$0xff]  }
  0x5e   :  { %s1333_s20 = sld [smem:[#allocation5 + $0x22]]  ;;  %s1335_s21 = sld [smem:[#allocation5 + $0x2f]]  ;;  %1001 = vmatpush3.bf16.msra.mxu0 %v1065_v7 }
  0x5f   :  { %s397_s22 = scalar_lea.vmem [#allocation6], %s1296_s25  ;;  %s361_s23 = scalar_lea.vmem [#allocation6], %s1298_s26  ;;  %1002 = vmatprep.subr.bf16.mxu0 %v1066_v8 }
  0x60   :  { %176 = vrot.lane.b32.xlu1 %v174_v10, %s1548_s16  ;;  %v398_v18 = vld [vmem:[%s397_s22] sm:$0x1]  ;;  %s1341_s24 = sld [smem:[#allocation5 + $0x2a]]  ;;  %s453_s29 = scalar_lea.vmem [#allocation6], %s1302_s27 }
  0x61   :  { %140 = vrot.lane.b32.xlu0 %v138_v11, %s1190_s30  ;;  %v362_v19 = vld [vmem:[%s361_s23] sm:$0x1]  ;;  %s417_s2 = scalar_lea.vmem [#allocation6], %s1304_s28  ;;  %s509_s25 = scalar_lea.vmem [#allocation6], %s1306_s4 }
  0x62   :  { %v454_v20 = vld [vmem:[%s453_s29] sm:$0x1]  ;;  %s1350_s26 = sld [smem:[#allocation5 + $0x37]]  ;;  %s1352_s7 = sld [smem:[#allocation5 + $0x32]] }
  0x63   :  { %v418_v21 = vld [vmem:[%s417_s2] sm:$0x1]  ;;  %s473_s8 = scalar_lea.vmem [#allocation6], %s1310_s17  ;;  %s1355_s12 = sld [smem:[#allocation5 + $0x3f]] }
  0x64   :  { %232 = vrot.lane.b32.xlu1 %v230_v12, %s1548_s16  ;;  %v510_v22 = vld [vmem:[%s509_s25] sm:$0x1]  ;;  %s1357_s27 = sld [smem:[#allocation5 + $0x3a]]  ;;  %s918_s28 = sld [smem:[#allocation5 + $0x14]] }
  0x65   :  { %196 = vrot.lane.b32.xlu0 %v194_v13, %s1190_s30  ;;  %v474_v23 = vld [vmem:[%s473_s8] sm:$0x1]  ;;  %s902_s15 = sld [smem:[#allocation5 + $0x4]]  ;;  %s125_s22 = scalar_lea.vmem [#allocation6], %s1312_s9 }
  0x66   :  { %v126_v24 = vld [vmem:[%s125_s22] sm:$0x1]  ;;  %s87_s23 = scalar_lea.vmem [#allocation6], %s1314_s10  ;;  %s926_s4 = sld [smem:[#allocation5 + $0x1c]] }
  0x67   :  { %v88_v25 = vld [vmem:[%s87_s23] sm:$0x1]  ;;  %s910_s29 = sld [smem:[#allocation5 + $0xc]]  ;;  %s1371_s6 = sld [smem:[#allocation5]] }
  0x68   :  { %288 = vrot.lane.b32.xlu1 %v286_v14, %s1548_s16  ;;  %s1363_s17 = sld [smem:[#allocation5 + $0x2c]]  ;;  %s1373_s9 = sld [smem:[#allocation5 + $0x8]]  ;;  %v1067_v11 = vld [vmem:[#allocation9 + $0x38] sm:$0xff]  }
  0x69   :  { %252 = vrot.lane.b32.xlu0 %v250_v15, %s1190_s30  ;;  %s1365_s2 = sld [smem:[#allocation5 + $0x24]]  ;;  %s181_s10 = scalar_lea.vmem [#allocation6], %s1316_s11  ;;  %1003 = vmatpush3.bf16.msra.mxu0 %v1067_v11  ;;  %v1074_v11 = vld [vmem:[#allocation11 + $0x30] sm:$0xff]  }
  0x6a   :  { %1553 = sst [smem:[#allocation17_spill]] %s1357_s27  ;;  %s1367_s25 = sld [smem:[#allocation5 + $0x3c]]  ;;  %v182_v26 = vld [vmem:[%s181_s10] sm:$0x1] }
  0x6b   :  { %s1369_s8 = sld [smem:[#allocation5 + $0x34]]  ;;  %s145_s22 = scalar_lea.vmem [#allocation6], %s1320_s13 }
  0x6c   :  { %344 = vrot.lane.b32.xlu1 %v342_v16, %s1548_s16  ;;  %v146_v27 = vld [vmem:[%s145_s22] sm:$0x1]  ;;  %s1377_s23 = sld [smem:[#allocation5 + $0x10]]  ;;  %s1554_s5 = smov 64   ;;  %v1068_v16 = vld [vmem:[#allocation11] sm:$0xff]  }
  0x6d   :  { %308 = vrot.lane.b32.xlu0 %v306_v17, %s1190_s30  ;;  %s217_s3 = scalar_lea.vmem [#allocation6], %s918_s28  ;;  %s105_s27 = scalar_lea.vmem [#allocation6], %s902_s15  ;;  %v1192_v17 = vmov 0.0  }
  0x6e   :  { %v218_v28 = vld [vmem:[%s217_s3] sm:$0x1]  ;;  %s273_s11 = scalar_lea.vmem [#allocation6], %s926_s4  ;;  %s161_s13 = scalar_lea.vmem [#allocation6], %s910_s29  ;;  %1019 = vmatprep.subr.bf16.mxu1 %v1192_v17  ;;  %1035 = vmatprep.mubr.msk.bf16.mxu1 %vm1193_vm4, %v1192_v17 }
  0x6f   :  { %v106_v29 = vld [vmem:[%s105_s27] sm:$0x1]  ;;  %219 = vst.msk [vmem:[#allocation2 + $0xa] sm:$0x1] %vm75_vm0, %v218_v28  ;;  %s237_s10 = scalar_lea.vmem [#allocation6], %s1322_s14  ;;  %s201_s22 = scalar_lea.vmem [#allocation6], %s1325_s0  ;;  %1020 = vmatpush3.bf16.msra.mxu1 %v1068_v16 }
  0x70   :  { %400 = vrot.lane.b32.xlu1 %v398_v18, %s1548_s16  ;;  %107 = vst.msk [vmem:[#allocation2 + $0x8] sm:$0x1] %vm75_vm0, %v106_v29  ;;  %v274_v30 = vld [vmem:[%s273_s11] sm:$0x1]  ;;  %s385_s3 = scalar_lea.vmem [#allocation6], %s1363_s17  ;;  %s329_s27 = scalar_lea.vmem [#allocation6], %s1365_s2  ;;  %1021 = vmatprep.subr.bf16.mxu1 %v1192_v17 }
  0x71   :  { %364 = vrot.lane.b32.xlu0 %v362_v19, %s1190_s30  ;;  %v162_v31 = vld [vmem:[%s161_s13] sm:$0x1]  ;;  %275 = vst.msk [vmem:[#allocation2 + $0xb] sm:$0x1] %vm75_vm0, %v274_v30  ;;  %s497_s14 = scalar_lea.vmem [#allocation6], %s1367_s25  ;;  %s441_s0 = scalar_lea.vmem [#allocation6], %s1369_s8 }
  0x72   :  { %v238_v32 = vld [vmem:[%s237_s10] sm:$0x1]  ;;  %163 = vst.msk [vmem:[#allocation2 + $0x9] sm:$0x1] %vm75_vm0, %v162_v31  ;;  %s73_s28 = scalar_lea.vmem [#allocation6], %s1371_s6  ;;  %s133_s15 = scalar_lea.vmem [#allocation6], %s1373_s9 }
  0x73   :  { %v202_v33 = vld [vmem:[%s201_s22] sm:$0x1]  ;;  %s189_s4 = scalar_lea.vmem [#allocation6], %s1377_s23  ;;  %s930_s17 = sld [smem:[#allocation5 + $0x20]]  ;;  %v1069_v18 = vld [vmem:[#allocation11 + $0x8] sm:$0xff]   ;;  %v1070_v19 = vld [vmem:[#allocation11 + $0x10] sm:$0xff]  }
  0x74   :  { %456 = vrot.lane.b32.xlu1 %v454_v20, %s1548_s16  ;;  %v386_v34 = vld [vmem:[%s385_s3] sm:$0x1]  ;;  %s293_s2 = scalar_lea.vmem [#allocation6], %s1327_s18  ;;  %s257_s25 = scalar_lea.vmem [#allocation6], %s1329_s19  ;;  %1022 = vmatpush3.bf16.msra.mxu1 %v1069_v18 }
  0x75   :  { %420 = vrot.lane.b32.xlu0 %v418_v21, %s1190_s30  ;;  %v330_v35 = vld [vmem:[%s329_s27] sm:$0x1]  ;;  %387 = vst.msk [vmem:[#allocation2 + $0xd] sm:$0x1] %vm75_vm0, %v386_v34  ;;  %s938_s6 = sld [smem:[#allocation5 + $0x28]]  ;;  %s349_s18 = scalar_lea.vmem [#allocation6], %s1331_s1  ;;  %1023 = vmatprep.subr.bf16.mxu1 %v1192_v17 }
  0x76   :  { %331 = vst.msk [vmem:[#allocation2 + $0xc] sm:$0x1] %vm75_vm0, %v330_v35  ;;  %v498_v36 = vld [vmem:[%s497_s14] sm:$0x1]  ;;  %s946_s8 = sld [smem:[#allocation5 + $0x30]]  ;;  %s313_s19 = scalar_lea.vmem [#allocation6], %s1333_s20 }
  0x77   :  { %v442_v37 = vld [vmem:[%s441_s0] sm:$0x1]  ;;  %499 = vst.msk [vmem:[#allocation2 + $0xf] sm:$0x1] %vm75_vm0, %v498_v36  ;;  %s1411_s9 = sld [smem:[#allocation5 + $0x38]]  ;;  %s1415_s23 = sld [smem:[#allocation5 + $0xb]] }
  0x78   :  { %512 = vrot.lane.b32.xlu1 %v510_v22, %s1548_s16  ;;  %s1191_s16 = smov 96   ;;  %443 = vst.msk [vmem:[#allocation2 + $0xe] sm:$0x1] %vm75_vm0, %v442_v37  ;;  %v74_v38 = vld [vmem:[%s73_s28] sm:$0x1]  ;;  %s405_s11 = scalar_lea.vmem [#allocation6], %s1335_s21  ;;  %1024 = vmatpush3.bf16.msra.mxu1 %v1070_v19 }
  0x79   :  { %476 = vrot.lane.b32.xlu0 %v474_v23, %s1190_s30  ;;  %s1379_s30 = sld [smem:[#allocation5 + $0x18]]  ;;  %v134_v39 = vld [vmem:[%s133_s15] sm:$0x1]  ;;  %76 = vst.msk [vmem:[#allocation2] sm:$0x1] %vm75_vm0, %v74_v38  ;;  %s369_s13 = scalar_lea.vmem [#allocation6], %s1341_s24  ;;  %1025 = vmatprep.subr.bf16.mxu1 %v1192_v17 }
  0x7a   :  { %135 = vst.msk [vmem:[#allocation2 + $0x1] sm:$0x1] %vm75_vm0, %v134_v39  ;;  %v190_v40 = vld [vmem:[%s189_s4] sm:$0x1]  ;;  %s1422_s10 = sld [smem:[#allocation5 + $0x3]]  ;;  %s461_s3 = scalar_lea.vmem [#allocation6], %s1350_s26 }
  0x7b   :  { %v294_v42 = vld [vmem:[%s293_s2] sm:$0x1]  ;;  %191 = vst.msk [vmem:[#allocation2 + $0x2] sm:$0x1] %vm75_vm0, %v190_v40  ;;  %s357_s1 = scalar_lea.vmem [#allocation6], %s938_s6  ;;  %s1555_s21 = sld [smem:[#allocation17_spill]] }
  0x7c   :  { %128 = vrot.lane.b32.xlu1 %v126_v24, %s1191_s16  ;;  %v258_v43 = vld [vmem:[%s257_s25] sm:$0x1]  ;;  %s413_s20 = scalar_lea.vmem [#allocation6], %s946_s8  ;;  %s1432_s24 = sld [smem:[#allocation5 + $0x1b]] }
  0x7d   :  { %90 = vrot.lane.b32.xlu0 %v88_v25, %s1554_s5  ;;  %v350_v46 = vld [vmem:[%s349_s18] sm:$0x1]  ;;  %s469_s22 = scalar_lea.vmem [#allocation6], %s1411_s9  ;;  %s425_s27 = scalar_lea.vmem [#allocation6], %s1352_s7 }
  0x7e   :  { %v314_v47 = vld [vmem:[%s313_s19] sm:$0x1]  ;;  %s1436_s14 = sld [smem:[#allocation5 + $0x13]]  ;;  %s517_s28 = scalar_lea.vmem [#allocation6], %s1355_s12 }
  0x7f   :  { %s245_s29 = scalar_lea.vmem [#allocation6], %s1379_s30  ;;  %s301_s30 = scalar_lea.vmem [#allocation6], %s930_s17  ;;  %v358_v51 = vld [vmem:[%s357_s1] sm:$0x1] }
  0x80   :  { %184 = vrot.lane.b32.xlu1 %v182_v26, %s1191_s16  ;;  %v246_v41 = vld [vmem:[%s245_s29] sm:$0x1]  ;;  %359 = vst.msk [vmem:[#allocation2 + $0x5] sm:$0x1] %vm75_vm0, %v358_v51  ;;  %s1440_s0 = sld [smem:[#allocation5 + $0x2b]]  ;;  %s153_s4 = scalar_lea.vmem [#allocation6], %s1415_s23 }
  0x81   :  { %148 = vrot.lane.b32.xlu0 %v146_v27, %s1554_s5  ;;  %247 = vst.msk [vmem:[#allocation2 + $0x3] sm:$0x1] %vm75_vm0, %v246_v41  ;;  %v302_v50 = vld [vmem:[%s301_s30] sm:$0x1]  ;;  %s481_s26 = scalar_lea.vmem [#allocation6], %s1555_s21  ;;  %s1444_s7 = sld [smem:[#allocation5 + $0x23]] }
  0x82   :  { %303 = vst.msk [vmem:[#allocation2 + $0x4] sm:$0x1] %vm75_vm0, %v302_v50  ;;  %v414_v52 = vld [vmem:[%s413_s20] sm:$0x1]  ;;  %s1448_s15 = sld [smem:[#allocation5 + $0x3b]]  ;;  %s96_s12 = scalar_lea.vmem [#allocation6], %s1422_s10 }
  0x83   :  { %v406_v53 = vld [vmem:[%s405_s11] sm:$0x1]  ;;  %415 = vst.msk [vmem:[#allocation2 + $0x6] sm:$0x1] %vm75_vm0, %v414_v52  ;;  %s949_s29 = sld [smem:[#allocation5 + $0x33]]  ;;  %s1556_s18 = sld [smem:[#allocation18_spill]] }
  0x84   :  { %240 = vrot.lane.b32.xlu1 %v238_v32, %s1191_s16  ;;  %v370_v54 = vld [vmem:[%s369_s13] sm:$0x1]  ;;  %s209_s17 = scalar_lea.vmem [#allocation6], %s1436_s14  ;;  %s1557_s30 = sld [smem:[#allocation19_spill]] }
  0x85   :  { %204 = vrot.lane.b32.xlu0 %v202_v33, %s1554_s5  ;;  %v470_v55 = vld [vmem:[%s469_s22] sm:$0x1]  ;;  %s1194_s1 = smov [#allocation12]  }
  0x86   :  { %471 = vst.msk [vmem:[#allocation2 + $0x7] sm:$0x1] %vm75_vm0, %v470_v55  ;;  %v462_v60 = vld [vmem:[%s461_s3] sm:$0x1]  ;;  %s377_s2 = scalar_lea.vmem [#allocation6], %s1440_s0  ;;  %s825_s20 = sshll.u32 %s1194_s1, 4  ;;  %s826_s20 = int_to_ptr.vmem [resolvable:$true] %s825_s20 }
  0x87   :  { %v426_v61 = vld [vmem:[%s425_s27] sm:$0x1]  ;;  %s321_s25 = scalar_lea.vmem [#allocation6], %s1444_s7  ;;  %s1152_s11 = scalar_lea.vmem %s826_s20, 128 }
  0x88   :  { %296 = vrot.lane.b32.xlu1 %v294_v42, %s1191_s16  ;;  %v518_v0 = vld [vmem:[%s517_s28] sm:$0x1]  ;;  %s489_s6 = scalar_lea.vmem [#allocation6], %s1448_s15  ;;  %p1153_p13 = scmp.ne.s32.totalorder %s826_s20, %s1152_s11 }
  0x89   :  { %260 = vrot.lane.b32.xlu0 %v258_v43, %s1554_s5  ;;  %v482_v1 = vld [vmem:[%s481_s26] sm:$0x1]  ;;  %s433_s8 = scalar_lea.vmem [#allocation6], %s949_s29  ;;  %p1157_p0 = scmp.lt.s32.totalorder %s826_s20, %s826_s20 }
  0x8a   :  { %v154_v4 = vld [vmem:[%s153_s4] sm:$0x1]  ;;  %p1158_p1 = scmp.lt.s32.totalorder %s1152_s11, %s1152_s11 }
  0x8b   :  { %v97_v5 = vld [vmem:[%s96_s12] sm:$0x1] }
  0x8c   :  { %352 = vrot.lane.b32.xlu1 %v350_v46, %s1191_s16  ;;  %v210_v10 = vld [vmem:[%s209_s17] sm:$0x1]  ;;  %p1159_p2 = por %p1158_p1, %p1157_p0 }
  0x8d   :  { %316 = vrot.lane.b32.xlu0 %v314_v47, %s1554_s5  ;;  %v378_v12 = vld [vmem:[%s377_s2] sm:$0x1] }
  0x8e   :  { %v322_v13 = vld [vmem:[%s321_s25] sm:$0x1]  ;;  %p1160_p3 = pnand %p1159_p2, %p1153_p13 }
  0x8f   :  { %v490_v14 = vld [vmem:[%s489_s6] sm:$0x1] }
  0x90   :  { %408 = vrot.lane.b32.xlu1 %v406_v53, %s1191_s16  ;;  %v434_v15 = vld [vmem:[%s433_s8] sm:$0x1] }
  0x91   :  { %372 = vrot.lane.b32.xlu0 %v370_v54, %s1554_s5  ;;  %v1071_v20 = vld [vmem:[#allocation11 + $0x18] sm:$0xff]  }
  0x92   :  { %1026 = vmatpush3.bf16.msra.mxu1 %v1071_v20 }
  0x93   :  { %1027 = vmatprep.subr.bf16.mxu1 %v1192_v17 }
  0x94   :  { %464 = vrot.lane.b32.xlu1 %v462_v60, %s1191_s16 }
  0x95   :  { %428 = vrot.lane.b32.xlu0 %v426_v61, %s1554_s5 }
  0x98   :  { %520 = vrot.lane.b32.xlu1 %v518_v0, %s1191_s16 }
  0x99   :  { %484 = vrot.lane.b32.xlu0 %v482_v1, %s1554_s5  ;;  %s265_s5 = scalar_lea.vmem [#allocation6], %s1432_s24 }
  0x9a   :  { %v266_v9 = vld [vmem:[%s265_s5] sm:$0x1] }
  0x9c   :  { %156 = vrot.lane.b32.xlu1 %v154_v4, %s1191_s16 }
  0x9d   :  { %99 = vrot.lane.b32.xlu0 %v97_v5, %s1191_s16 }
  0xa0   :  { %268 = vrot.lane.b32.xlu1 %v266_v9, %s1191_s16  ;;  %v1072_v9 = vld [vmem:[#allocation11 + $0x20] sm:$0xff]  }
  0xa1   :  { %212 = vrot.lane.b32.xlu0 %v210_v10, %s1191_s16  ;;  %1028 = vmatpush3.bf16.msra.mxu1 %v1072_v9  ;;  %v1073_v10 = vld [vmem:[#allocation11 + $0x28] sm:$0xff]  }
  0xa2   :  { %1029 = vmatprep.subr.bf16.mxu1 %v1192_v17 }
  0xa4   :  { %380 = vrot.lane.b32.xlu1 %v378_v12, %s1191_s16  ;;  %v1075_v12 = vld [vmem:[#allocation11 + $0x38] sm:$0xff]  }
  0xa5   :  { %324 = vrot.lane.b32.xlu0 %v322_v13, %s1191_s16  ;;  %1030 = vmatpush3.bf16.msra.mxu1 %v1073_v10 }
  0xa6   :  { %1031 = vmatprep.subr.bf16.mxu1 %v1192_v17 }
  0xa8   :  { %492 = vrot.lane.b32.xlu1 %v490_v14, %s1191_s16  ;;  %v962_v14 = vld [vmem:[%s1556_s18] ss:$0 sm:$0xff] }
  0xa9   :  { %436 = vrot.lane.b32.xlu0 %v434_v15, %s1191_s16  ;;  %1032 = vmatpush3.bf16.msra.mxu1 %v1074_v11 }
  0xaa   :  { %1033 = vmatprep.subr.bf16.mxu1 %v1192_v17  ;;  %v979_v17 = vld [vmem:[%s1557_s30] ss:$0 sm:$0xff] }
  0xad   :  { %1034 = vmatpush3.bf16.msra.mxu1 %v1075_v12 }
  0xbe   :  { %v225_v21 = vpop.permute.xlu1 %224 }
  0xbf   :  { %v113_v22 = vpop.permute.xlu0 %112  ;;  %227 = vst.msk [vmem:[#allocation2 + $0xa] sm:$0x1] %vm84_vm1, %v225_v21 }
  0xc0   :  { %115 = vst.msk [vmem:[#allocation2 + $0x8] sm:$0x1] %vm84_vm1, %v113_v22 }
  0xc2   :  { %v281_v23 = vpop.permute.xlu1 %280 }
  0xc3   :  { %v169_v24 = vpop.permute.xlu0 %168  ;;  %283 = vst.msk [vmem:[#allocation2 + $0xb] sm:$0x1] %vm84_vm1, %v281_v23 }
  0xc4   :  { %171 = vst.msk [vmem:[#allocation2 + $0x9] sm:$0x1] %vm84_vm1, %v169_v24 }
  0xc6   :  { %v393_v25 = vpop.permute.xlu1 %392 }
  0xc7   :  { %v337_v26 = vpop.permute.xlu0 %336  ;;  %395 = vst.msk [vmem:[#allocation2 + $0xd] sm:$0x1] %vm84_vm1, %v393_v25 }
  0xc8   :  { %339 = vst.msk [vmem:[#allocation2 + $0xc] sm:$0x1] %vm84_vm1, %v337_v26 }
  0xca   :  { %v505_v27 = vpop.permute.xlu1 %504 }
  0xcb   :  { %v449_v28 = vpop.permute.xlu0 %448  ;;  %507 = vst.msk [vmem:[#allocation2 + $0xf] sm:$0x1] %vm84_vm1, %v505_v27 }
  0xcc   :  { %451 = vst.msk [vmem:[#allocation2 + $0xe] sm:$0x1] %vm84_vm1, %v449_v28 }
  0xce   :  { %v121_v29 = vpop.permute.xlu1 %120 }
  0xcf   :  { %v82_v30 = vpop.permute.xlu0 %81  ;;  %123 = vst.msk [vmem:[#allocation2 + $0x8] sm:$0x1] %vm93_vm2, %v121_v29 }
  0xd0   :  { %85 = vst.msk [vmem:[#allocation2] sm:$0x1] %vm84_vm1, %v82_v30 }
  0xd2   :  { %v177_v31 = vpop.permute.xlu1 %176 }
  0xd3   :  { %v141_v32 = vpop.permute.xlu0 %140  ;;  %179 = vst.msk [vmem:[#allocation2 + $0x9] sm:$0x1] %vm93_vm2, %v177_v31 }
  0xd4   :  { %143 = vst.msk [vmem:[#allocation2 + $0x1] sm:$0x1] %vm84_vm1, %v141_v32 }
  0xd6   :  { %v233_v33 = vpop.permute.xlu1 %232 }
  0xd7   :  { %v197_v34 = vpop.permute.xlu0 %196  ;;  %235 = vst.msk [vmem:[#allocation2 + $0xa] sm:$0x1] %vm93_vm2, %v233_v33 }
  0xd8   :  { %199 = vst.msk [vmem:[#allocation2 + $0x2] sm:$0x1] %vm84_vm1, %v197_v34 }
  0xda   :  { %v289_v35 = vpop.permute.xlu1 %288 }
  0xdb   :  { %v253_v36 = vpop.permute.xlu0 %252  ;;  %291 = vst.msk [vmem:[#allocation2 + $0xb] sm:$0x1] %vm93_vm2, %v289_v35 }
  0xdc   :  { %255 = vst.msk [vmem:[#allocation2 + $0x3] sm:$0x1] %vm84_vm1, %v253_v36 }
  0xde   :  { %v345_v37 = vpop.permute.xlu1 %344 }
  0xdf   :  { %v309_v38 = vpop.permute.xlu0 %308  ;;  %347 = vst.msk [vmem:[#allocation2 + $0xc] sm:$0x1] %vm93_vm2, %v345_v37 }
  0xe0   :  { %311 = vst.msk [vmem:[#allocation2 + $0x4] sm:$0x1] %vm84_vm1, %v309_v38 }
  0xe2   :  { %v401_v39 = vpop.permute.xlu1 %400 }
  0xe3   :  { %v365_v40 = vpop.permute.xlu0 %364  ;;  %403 = vst.msk [vmem:[#allocation2 + $0xd] sm:$0x1] %vm93_vm2, %v401_v39 }
  0xe4   :  { %367 = vst.msk [vmem:[#allocation2 + $0x5] sm:$0x1] %vm84_vm1, %v365_v40 }
  0xe6   :  { %v457_v41 = vpop.permute.xlu1 %456 }
  0xe7   :  { %v421_v42 = vpop.permute.xlu0 %420  ;;  %459 = vst.msk [vmem:[#allocation2 + $0xe] sm:$0x1] %vm93_vm2, %v457_v41 }
  0xe8   :  { %423 = vst.msk [vmem:[#allocation2 + $0x6] sm:$0x1] %vm84_vm1, %v421_v42 }
  0xea   :  { %v513_v43 = vpop.permute.xlu1 %512 }
  0xeb   :  { %v477_v44 = vpop.permute.xlu0 %476  ;;  %515 = vst.msk [vmem:[#allocation2 + $0xf] sm:$0x1] %vm93_vm2, %v513_v43 }
  0xec   :  { %479 = vst.msk [vmem:[#allocation2 + $0x7] sm:$0x1] %vm84_vm1, %v477_v44 }
  0xee   :  { %v129_v45 = vpop.permute.xlu1 %128 }
  0xef   :  { %v91_v46 = vpop.permute.xlu0 %90  ;;  %131 = vst.msk [vmem:[#allocation2 + $0x8] sm:$0x1] %vm102_vm3, %v129_v45 }
  0xf0   :  { %94 = vst.msk [vmem:[#allocation2] sm:$0x1] %vm93_vm2, %v91_v46 }
  0xf2   :  { %v185_v47 = vpop.permute.xlu1 %184 }
  0xf3   :  { %v149_v48 = vpop.permute.xlu0 %148  ;;  %187 = vst.msk [vmem:[#allocation2 + $0x9] sm:$0x1] %vm102_vm3, %v185_v47 }
  0xf4   :  { %151 = vst.msk [vmem:[#allocation2 + $0x1] sm:$0x1] %vm93_vm2, %v149_v48 }
  0xf6   :  { %v241_v49 = vpop.permute.xlu1 %240 }
  0xf7   :  { %v205_v50 = vpop.permute.xlu0 %204  ;;  %243 = vst.msk [vmem:[#allocation2 + $0xa] sm:$0x1] %vm102_vm3, %v241_v49 }
  0xf8   :  { %207 = vst.msk [vmem:[#allocation2 + $0x2] sm:$0x1] %vm93_vm2, %v205_v50 }
  0xfa   :  { %v297_v51 = vpop.permute.xlu1 %296 }
  0xfb   :  { %v261_v52 = vpop.permute.xlu0 %260  ;;  %299 = vst.msk [vmem:[#allocation2 + $0xb] sm:$0x1] %vm102_vm3, %v297_v51 }
  0xfc   :  { %263 = vst.msk [vmem:[#allocation2 + $0x3] sm:$0x1] %vm93_vm2, %v261_v52 }
  0xfe   :  { %v353_v53 = vpop.permute.xlu1 %352 }
  0xff   :  { %v317_v54 = vpop.permute.xlu0 %316  ;;  %355 = vst.msk [vmem:[#allocation2 + $0xc] sm:$0x1] %vm102_vm3, %v353_v53 }
 0x100   :  { %319 = vst.msk [vmem:[#allocation2 + $0x4] sm:$0x1] %vm93_vm2, %v317_v54 }
 0x102   :  { %v409_v55 = vpop.permute.xlu1 %408 }
 0x103   :  { %v373_v56 = vpop.permute.xlu0 %372  ;;  %411 = vst.msk [vmem:[#allocation2 + $0xd] sm:$0x1] %vm102_vm3, %v409_v55 }
 0x104   :  { %375 = vst.msk [vmem:[#allocation2 + $0x5] sm:$0x1] %vm93_vm2, %v373_v56 }
 0x106   :  { %v465_v57 = vpop.permute.xlu1 %464 }
 0x107   :  { %v429_v58 = vpop.permute.xlu0 %428  ;;  %467 = vst.msk [vmem:[#allocation2 + $0xe] sm:$0x1] %vm102_vm3, %v465_v57 }
 0x108   :  { %431 = vst.msk [vmem:[#allocation2 + $0x6] sm:$0x1] %vm93_vm2, %v429_v58 }
 0x10a   :  { %v521_v59 = vpop.permute.xlu1 %520 }
 0x10b   :  { %v485_v60 = vpop.permute.xlu0 %484  ;;  %523 = vst.msk [vmem:[#allocation2 + $0xf] sm:$0x1] %vm102_vm3, %v521_v59 }
 0x10c   :  { %487 = vst.msk [vmem:[#allocation2 + $0x7] sm:$0x1] %vm93_vm2, %v485_v60 }
 0x10e   :  { %v157_v61 = vpop.permute.xlu1 %156 }
 0x10f   :  { %v100_v62 = vpop.permute.xlu0 %99  ;;  %159 = vst.msk [vmem:[#allocation2 + $0x1] sm:$0x1] %vm102_vm3, %v157_v61 }
 0x110   :  { %103 = vst.msk [vmem:[#allocation2] sm:$0x1] %vm102_vm3, %v100_v62 }
 0x112   :  { %v269_v63 = vpop.permute.xlu1 %268  ;;  %v525_v1 = vld [vmem:[#allocation2 + $0x8] sm:$0xff] }
 0x113   :  { %v213_v0 = vpop.permute.xlu0 %212  ;;  %271 = vst.msk [vmem:[#allocation2 + $0x3] sm:$0x1] %vm102_vm3, %v269_v63  ;;  %v527_v2 = vpack.c.bf16 %v525_v1, %v525_v1 }
 0x114   :  { %215 = vst.msk [vmem:[#allocation2 + $0x2] sm:$0x1] %vm102_vm3, %v213_v0 }
 0x115   :  { %695 = vmatprep.mubr.bf16.mxu0 %v527_v2 }
 0x116   :  { %v381_v3 = vpop.permute.xlu1 %380 }
 0x117   :  { %v325_v4 = vpop.permute.xlu0 %324  ;;  %383 = vst.msk [vmem:[#allocation2 + $0x5] sm:$0x1] %vm102_vm3, %v381_v3 }
 0x118   :  { %327 = vst.msk [vmem:[#allocation2 + $0x4] sm:$0x1] %vm102_vm3, %v325_v4 }
 0x11a   :  { %v493_v5 = vpop.permute.xlu1 %492 }
 0x11b   :  { %v437_v6 = vpop.permute.xlu0 %436  ;;  %495 = vst.msk [vmem:[#allocation2 + $0x7] sm:$0x1] %vm102_vm3, %v493_v5 }
 0x11c   :  { %439 = vst.msk [vmem:[#allocation2 + $0x6] sm:$0x1] %vm102_vm3, %v437_v6 }
 0x123   :  { %v524_v7 = vld [vmem:[#allocation2] sm:$0xff] }
 0x124   :  { %v526_v8 = vpack.c.bf16 %v524_v7, %v524_v7 }
 0x126   :  { %696 = vmatmul.mubr.bf16.vlgmr.msra.gmra.mrb[0].mxu0 %v526_v8 }
 0x1f9   :  { %v1004_v13 = vpop.f32.mrb[0].mxu0 }
 0x1fa   :  { %v1005_v15 = vpop.f32.mrb[1].mxu0 }
 0x1fb   :  { %v1006_v16 = vadd.f32 %v1005_v15, %v1004_v13  ;;  %v1007_v18 = vpop.f32.mrb[2].mxu0 }
 0x1fc   :  { %v1008_v19 = vpop.f32.mrb[3].mxu0 }
 0x1fd   :  { %v698_v20 = vadd.f32 %v1006_v16, %v962_v14 }
 0x1ff   :  { %v703_v21 = vmax.f32 %v698_v20, 0.0 }
 0x201   :  { %v704_v22 = vpack.c.bf16 %v703_v21, %v703_v21 }
 0x203   :  { %705 = vst [vmem:[#allocation3] sm:$0xf] %v704_v22 }
 0x20a   :  { %v706_v23 = vld [vmem:[#allocation3] sm:$0xf] }
 0x20b   :  { %1036 = vmatmul.mubr.bf16.vlgmr.msra.gmra.mrb[0].mxu1 %v706_v23 }
 0x2de   :  { %v812_v24 = vpop.f32.mrb[0].mxu1 }
 0x2df   :  { %v813_v25 = vadd.f32 %v979_v17, %v812_v24  ;;  %v1037_v26 = vpop.f32.mrb[1].mxu1 }
 0x2e0   :  { %v815_v27 = vpop.f32.mrb[2].mxu1 }
 0x2e1   :  { %818 = vst [vmem:[#allocation12] sm:$0xff] %v813_v25  ;;  %v1038_v28 = vpop.f32.mrb[3].mxu1 }
 0x2e2   :  { %1163 = shalt.err (!%p1160_p3)
}
 0x2e3   :  { %s1558_s22 = sld [smem:[#allocation20_spill]] }
 0x2e9   :  { %s1164_s21 = scalar_lea.hbm %s1558_s22, 128 }
 0x2ea   :  { %p1165_p4 = scmp.ne.s32.totalorder %s1558_s22, %s1164_s21  ;;  %p1168_p5 = scmp.lt.u32.totalorder %s1164_s21, %s1558_s22 }
 0x2ec   :  { %p1170_p6 = pnand %p1168_p5, %p1165_p4 }
 0x2ee   :  { %1173 = shalt.err (!%p1170_p6)
}
 0x2ef   :  { %828 = dma.vmem_to_hbm [thread:$0]  %s826_s20, 128, %s1558_s22, [#allocation8]  }
 0x2f0   :  { %1180 = dma.done.wait [#allocation8], 128  }
 0x2f1   :  { %1181 = vsyncadd [#allocation8], 4294967168 }
 0x2f2   :  { %832 = vsyncpa [#allocation7], 1 }
 0x2f3   :  { %833 = vsyncpa [#allocation10], 1 }
 0x2f4   :  { %834 = vsyncpa [#allocation8], 1 }

</bundles_post_ra>
